<compile_context>
chip_gen: v7x
topology: tpu7x:2x2x1
jax: 0.10.0
libtpu: 0.0.40
codegen_flags: <defaults>
</compile_context>

<pallas_src>
import functools

import jax
import jax.numpy as jnp
from jax.experimental import pallas as pl
from jax.experimental.pallas import tpu as pltpu

fBase = 32
IMG_CHANS = 3          # data_size = [3, 32, 32]
ETA = 1e-6             # Constants.eta in MMVAE


def _round_up(x, m):
    return (x + m - 1) // m * m


# ---------------------------------------------------------------------------
# Pallas kernels
# ---------------------------------------------------------------------------
def _conv_mm_kernel(a_ref, w_ref, b_ref, o_ref, *, relu):
    """bf16 A @ bf16 W on the MXU, f32 accumulate; bias + ReLU fused in f32."""
    acc = jnp.dot(a_ref[...], w_ref[...], preferred_element_type=jnp.float32)
    acc = acc + b_ref[...]                       # (1, N) broadcasts to (tm, N)
    if relu:
        acc = jnp.maximum(acc, 0.0)
    o_ref[...] = acc.astype(o_ref.dtype)


def _head_kernel(a_ref, w_ref, b_ref, o_ref, *, latent_dim, eta):
    """Fused c1/c2 heads + softmax epilogue.

    Output columns [:L]  = mu
    Output columns [L:2L] = softmax(lv, axis=-1) * L + eta
    """
    acc = jnp.dot(a_ref[...], w_ref[...], preferred_element_type=jnp.float32)
    acc = acc + b_ref[...]                                   # (tm, 2L) f32
    L = latent_dim
    col = jax.lax.broadcasted_iota(jnp.int32, acc.shape, 1)
    is_lv = col >= L                                         # lv lanes only
    lv = jnp.where(is_lv, acc, -jnp.inf)
    m = jnp.max(lv, axis=-1, keepdims=True)
    e = jnp.exp(lv - m)                                      # masked lanes -> 0
    s = jnp.sum(e, axis=-1, keepdims=True)
    scale = e * pl.reciprocal(s, approx=True) * float(L) + eta
    o_ref[...] = jnp.where(is_lv, scale, acc)


# ---------------------------------------------------------------------------
# Pallas wrapper: M-tiled matmul (+ fused epilogue)
# ---------------------------------------------------------------------------
def _mm_pallas(kernel, a, w, b, out_n, out_dtype, *, tm_max=256):
    """a: [M, K] bf16, w: [K, N] bf16, b: [1, N] f32 -> [M, N] out_dtype."""
    M, K = a.shape
    tm = min(tm_max, _round_up(M, 16))        # bf16 sublane packing -> x16
    Mp = _round_up(M, tm)
    if Mp != M:                               # only pad M (never K)
        a = jnp.zeros((Mp, K), a.dtype).at[:M].set(a)

    out = pl.pallas_call(
        kernel,
        out_shape=jax.ShapeDtypeStruct((Mp, out_n), out_dtype),
        grid=(Mp // tm,),
        in_specs=[
            pl.BlockSpec((tm, K), lambda i: (i, 0)),     # A tile, pipelined over M
            pl.BlockSpec((K, out_n), lambda i: (0, 0)),  # weights resident
            pl.BlockSpec((1, out_n), lambda i: (0, 0)),  # bias resident
        ],
        out_specs=pl.BlockSpec((tm, out_n), lambda i: (i, 0)),
        compiler_params=pltpu.CompilerParams(
            dimension_semantics=("parallel",),
            vmem_limit_bytes=32 * 1024 * 1024,
        ),
    )(a, w, b)
    return out[:M] if Mp != M else out


# ---------------------------------------------------------------------------
# im2col in NHWC (K ordering = (kh, kw, C); matches the prepared weights)
# ---------------------------------------------------------------------------
# TODO(synk): for large batches, fold the patch extraction into the Pallas
# kernel (load an NHWC tile to VMEM, form k*k shifted views there) to avoid
# the k^2/stride^2 HBM expansion done here in XLA glue.
def _im2col_nhwc(x, k, stride, pad):
    B, H, W, C = x.shape
    xp = jnp.pad(x, ((0, 0), (pad, pad), (pad, pad), (0, 0)))
    Ho = (H + 2 * pad - k) // stride + 1
    Wo = (W + 2 * pad - k) // stride + 1
    cols = []
    for kh in range(k):
        for kw in range(k):
            cols.append(xp[:, kh:kh + stride * (Ho - 1) + 1:stride,
                              kw:kw + stride * (Wo - 1) + 1:stride, :])
    patches = jnp.concatenate(cols, axis=-1)        # [B,Ho,Wo,k*k*C]
    return patches.reshape(B * Ho * Wo, k * k * C), Ho, Wo


def conv_layer(x_nhwc, wf, b2, *, k, stride, pad, relu, out_dtype):
    """x: [B,H,W,C] bf16, wf: [k*k*C, Cout] bf16, b2: [1, Cout] f32."""
    B = x_nhwc.shape[0]
    patches, Ho, Wo = _im2col_nhwc(x_nhwc, k, stride, pad)
    out = _mm_pallas(functools.partial(_conv_mm_kernel, relu=relu),
                     patches, wf, b2, wf.shape[1], out_dtype)
    return out.reshape(B, Ho, Wo, wf.shape[1])


# ---------------------------------------------------------------------------
# Parameters (PyTorch-style init) + one-time preparation for the kernels
# ---------------------------------------------------------------------------
def init_enc_params(key, latent_dim):
    def conv_init(key, cout, cin, k):
        k1, k2 = jax.random.split(key)
        fan_in = cin * k * k
        bound = 1.0 / float(fan_in) ** 0.5
        w = jax.random.uniform(k1, (cout, cin, k, k), jnp.float32, -bound, bound)
        b = jax.random.uniform(k2, (cout,), jnp.float32, -bound, bound)
        return w, b

    keys = jax.random.split(key, 5)
    return {
        "conv1": conv_init(keys[0], fBase, IMG_CHANS, 4),
        "conv2": conv_init(keys[1], fBase * 2, fBase, 4),
        "conv3": conv_init(keys[2], fBase * 4, fBase * 2, 4),
        "c1": conv_init(keys[3], latent_dim, fBase * 4, 4),
        "c2": conv_init(keys[4], latent_dim, fBase * 4, 4),
    }


def _prep_conv(w, b):
    # [Cout, Cin, kh, kw] -> [kh*kw*Cin, Cout] bf16 (matches im2col K ordering).
    cout = w.shape[0]
    wf = jnp.transpose(w, (2, 3, 1, 0)).reshape(-1, cout).astype(jnp.bfloat16)
    return wf, b.reshape(1, cout).astype(jnp.float32)


def prepare_enc_params(params):
    prep = {name: _prep_conv(*params[name]) for name in ("conv1", "conv2", "conv3")}
    w1, b1 = _prep_conv(*params["c1"])
    w2, b2 = _prep_conv(*params["c2"])
    prep["head"] = (jnp.concatenate([w1, w2], axis=1),   # [2048, 2L]
                    jnp.concatenate([b1, b2], axis=1))   # [1, 2L]
    return prep


# ---------------------------------------------------------------------------
# Enc forward (NHWC internally; input is NCHW to match PyTorch)
# ---------------------------------------------------------------------------
def enc_forward(prep, x_nchw, *, latent_dim):
    B = x_nchw.shape[0]
    x = jnp.transpose(x_nchw.astype(jnp.float32), (0, 2, 3, 1)).astype(jnp.bfloat16)
    e = conv_layer(x, *prep["conv1"], k=4, stride=2, pad=1, relu=True,
                   out_dtype=jnp.bfloat16)                       # [B,16,16, 32]
    e = conv_layer(e, *prep["conv2"], k=4, stride=2, pad=1, relu=True,
                   out_dtype=jnp.bfloat16)                       # [B, 8, 8, 64]
    e = conv_layer(e, *prep["conv3"], k=4, stride=2, pad=1, relu=True,
                   out_dtype=jnp.bfloat16)                       # [B, 4, 4,128]
    patches, _, _ = _im2col_nhwc(e, 4, 1, 0)                     # [B, 2048]
    wf, bf = prep["head"]
    head = _mm_pallas(
        functools.partial(_head_kernel, latent_dim=latent_dim, eta=ETA),
        patches, wf, bf, 2 * latent_dim, jnp.float32)            # [B, 2L]
    mu = head[:, :latent_dim]
    scale = head[:, latent_dim:]
    # NOTE: torch's .squeeze() would also drop the batch dim when B == 1;
    # we deliberately keep the [B, L] shape.
    return mu, scale


# ---------------------------------------------------------------------------
# Pure-JAX reference (f32 XLA convs) for a loose correctness check
# ---------------------------------------------------------------------------
def enc_reference(params, x):
    def conv(x, w, b, stride, pad):
        y = jax.lax.conv_general_dilated(
            x, w, (stride, stride), [(pad, pad), (pad, pad)],
            dimension_numbers=("NCHW", "OIHW", "NCHW"))
        return y + b[None, :, None, None]

    B = x.shape[0]
    e = jax.nn.relu(conv(x, *params["conv1"], 2, 1))
    e = jax.nn.relu(conv(e, *params["conv2"], 2, 1))
    e = jax.nn.relu(conv(e, *params["conv3"], 2, 1))
    mu = conv(e, *params["c1"], 1, 0).reshape(B, -1)
    lv = conv(e, *params["c2"], 1, 0).reshape(B, -1)
    return mu, jax.nn.softmax(lv, axis=-1) * lv.shape[-1] + ETA


if __name__ == "__main__":
    latent_dim = 20
    batch = 2
    key = jax.random.PRNGKey(0)
    k_param, k_data = jax.random.split(key)

    params = init_enc_params(k_param, latent_dim)
    prep = prepare_enc_params(params)
    # SVHN-shaped input (3x32x32 is fixed by the module's conv stack).
    x = jax.random.normal(k_data, (batch, IMG_CHANS, 32, 32), dtype=jnp.float32)

    fwd = jax.jit(functools.partial(enc_forward, latent_dim=latent_dim))
    mu, scale = fwd(prep, x)
    jax.block_until_ready((mu, scale))

    assert mu.shape == (batch, latent_dim)
    assert scale.shape == (batch, latent_dim)
    assert bool(jnp.all(scale > 0.0))

    # Loose check vs f32 reference (operands are bf16 on the MXU).
    mu_ref, scale_ref = enc_reference(params, x)
    err_mu = float(jnp.max(jnp.abs(mu - mu_ref)) /
                   (jnp.max(jnp.abs(mu_ref)) + 1e-6))
    err_sc = float(jnp.max(jnp.abs(scale - scale_ref)) /
                   (jnp.max(jnp.abs(scale_ref)) + 1e-6))
    assert err_mu < 0.1 and err_sc < 0.1, (err_mu, err_sc)
    print("KERNEL_OK")
</pallas_src>

<mosaic_0001>
module attributes {stable_mosaic.version = 11 : i64} {
  func.func @_conv_mm_kernel(%arg0: i32, %arg1: memref<256x48xbf16, #tpu.memory_space<vmem>>, %arg2: memref<48x32xbf16, #tpu.memory_space<vmem>>, %arg3: memref<1x32xf32, #tpu.memory_space<vmem>>, %arg4: memref<256x32xbf16, #tpu.memory_space<vmem>>) attributes {dimension_semantics = [#tpu.dimension_semantics<parallel>], iteration_bounds = array<i64: 2>, scalar_prefetch = 0 : i64, scratch_operands = 0 : i64, tpu.core_type = #tpu.core_type<tc>, window_params = [{transform_indices = @transform_0, window_bounds = array<i64: 256, 48>}, {pipeline_mode = #tpu.pipeline_mode<synchronous>, transform_indices = @transform_1, window_bounds = array<i64: 48, 32>}, {pipeline_mode = #tpu.pipeline_mode<synchronous>, transform_indices = @transform_2, window_bounds = array<i64: 1, 32>}, {transform_indices = @transform_3, window_bounds = array<i64: 256, 32>}]} {
    %c0 = arith.constant 0 : index
    %c0_0 = arith.constant 0 : index
    %0 = vector.load %arg1[%c0, %c0_0] : memref<256x48xbf16, #tpu.memory_space<vmem>>, vector<256x48xbf16>
    %c0_1 = arith.constant 0 : index
    %c0_2 = arith.constant 0 : index
    %1 = vector.load %arg2[%c0_1, %c0_2] : memref<48x32xbf16, #tpu.memory_space<vmem>>, vector<48x32xbf16>
    %cst = arith.constant dense<0.000000e+00> : vector<256x32xf32>
    %2 = tpu.matmul %0, %1, %cst {dimension_numbers = #tpu.dot_dimension_numbers<[1], [0], [0], [1], [0, 0, 1, 1], [], []>} : vector<256x48xbf16>, vector<48x32xbf16>, vector<256x32xf32> -> vector<256x32xf32>
    %c0_3 = arith.constant 0 : index
    %c0_4 = arith.constant 0 : index
    %3 = vector.load %arg3[%c0_3, %c0_4] : memref<1x32xf32, #tpu.memory_space<vmem>>, vector<1x32xf32>
    %4 = vector.broadcast %3 : vector<1x32xf32> to vector<256x32xf32>
    %5 = arith.addf %2, %4 : vector<256x32xf32>
    %cst_5 = arith.constant 0.000000e+00 : f32
    %6 = vector.broadcast %cst_5 : f32 to vector<256x32xf32>
    %7 = arith.maximumf %5, %6 : vector<256x32xf32>
    %8 = arith.truncf %7 : vector<256x32xf32> to vector<256x32xbf16>
    %c0_6 = arith.constant 0 : index
    %c0_7 = arith.constant 0 : index
    %9 = vector.load %arg4[%c0_6, %c0_7] : memref<256x32xbf16, #tpu.memory_space<vmem>>, vector<256x32xbf16>
    tpu.vector_store %arg4[%c0_6, %c0_7], %8 {strides = array<i32>} : memref<256x32xbf16, #tpu.memory_space<vmem>>, vector<256x32xbf16>,
    return
  }
  func.func @transform_0(%arg0: i32) -> (i32, i32) {
    %c0_i32 = arith.constant 0 : i32
    %c0_i32_0 = arith.constant 0 : i32
    return %arg0, %c0_i32 : i32, i32
  }
  func.func @transform_1(%arg0: i32) -> (i32, i32) {
    %c0_i32 = arith.constant 0 : i32
    %c0_i32_0 = arith.constant 0 : i32
    %c0_i32_1 = arith.constant 0 : i32
    return %c0_i32, %c0_i32_0 : i32, i32
  }
  func.func @transform_2(%arg0: i32) -> (i32, i32) {
    %c0_i32 = arith.constant 0 : i32
    %c0_i32_0 = arith.constant 0 : i32
    %c0_i32_1 = arith.constant 0 : i32
    return %c0_i32, %c0_i32_0 : i32, i32
  }
  func.func @transform_3(%arg0: i32) -> (i32, i32) {
    %c0_i32 = arith.constant 0 : i32
    %c0_i32_0 = arith.constant 0 : i32
    return %arg0, %c0_i32 : i32, i32
  }
}

module attributes {stable_mosaic.version = 11 : i64} {
  func.func @_conv_mm_kernel(%arg0: i32, %arg1: memref<128x512xbf16, #tpu.memory_space<vmem>>, %arg2: memref<512x64xbf16, #tpu.memory_space<vmem>>, %arg3: memref<1x64xf32, #tpu.memory_space<vmem>>, %arg4: memref<128x64xbf16, #tpu.memory_space<vmem>>) attributes {dimension_semantics = [#tpu.dimension_semantics<parallel>], iteration_bounds = array<i64: 1>, scalar_prefetch = 0 : i64, scratch_operands = 0 : i64, tpu.core_type = #tpu.core_type<tc>, window_params = [{transform_indices = @transform_0, window_bounds = array<i64: 128, 512>}, {pipeline_mode = #tpu.pipeline_mode<synchronous>, transform_indices = @transform_1, window_bounds = array<i64: 512, 64>}, {pipeline_mode = #tpu.pipeline_mode<synchronous>, transform_indices = @transform_2, window_bounds = array<i64: 1, 64>}, {transform_indices = @transform_3, window_bounds = array<i64: 128, 64>}]} {
    %c0 = arith.constant 0 : index
    %c0_0 = arith.constant 0 : index
    %0 = vector.load %arg1[%c0, %c0_0] : memref<128x512xbf16, #tpu.memory_space<vmem>>, vector<128x512xbf16>
    %c0_1 = arith.constant 0 : index
    %c0_2 = arith.constant 0 : index
    %1 = vector.load %arg2[%c0_1, %c0_2] : memref<512x64xbf16, #tpu.memory_space<vmem>>, vector<512x64xbf16>
    %cst = arith.constant dense<0.000000e+00> : vector<128x64xf32>
    %2 = tpu.matmul %0, %1, %cst {dimension_numbers = #tpu.dot_dimension_numbers<[1], [0], [0], [1], [0, 0, 1, 1], [], []>} : vector<128x512xbf16>, vector<512x64xbf16>, vector<128x64xf32> -> vector<128x64xf32>
    %c0_3 = arith.constant 0 : index
    %c0_4 = arith.constant 0 : index
    %3 = vector.load %arg3[%c0_3, %c0_4] : memref<1x64xf32, #tpu.memory_space<vmem>>, vector<1x64xf32>
    %4 = vector.broadcast %3 : vector<1x64xf32> to vector<128x64xf32>
    %5 = arith.addf %2, %4 : vector<128x64xf32>
    %cst_5 = arith.constant 0.000000e+00 : f32
    %6 = vector.broadcast %cst_5 : f32 to vector<128x64xf32>
    %7 = arith.maximumf %5, %6 : vector<128x64xf32>
    %8 = arith.truncf %7 : vector<128x64xf32> to vector<128x64xbf16>
    %c0_6 = arith.constant 0 : index
    %c0_7 = arith.constant 0 : index
    %9 = vector.load %arg4[%c0_6, %c0_7] : memref<128x64xbf16, #tpu.memory_space<vmem>>, vector<128x64xbf16>
    tpu.vector_store %arg4[%c0_6, %c0_7], %8 {strides = array<i32>} : memref<128x64xbf16, #tpu.memory_space<vmem>>, vector<128x64xbf16>,
    return
  }
  func.func @transform_0(%arg0: i32) -> (i32, i32) {
    %c0_i32 = arith.constant 0 : i32
    %c0_i32_0 = arith.constant 0 : i32
    return %arg0, %c0_i32 : i32, i32
  }
  func.func @transform_1(%arg0: i32) -> (i32, i32) {
    %c0_i32 = arith.constant 0 : i32
    %c0_i32_0 = arith.constant 0 : i32
    %c0_i32_1 = arith.constant 0 : i32
    return %c0_i32, %c0_i32_0 : i32, i32
  }
  func.func @transform_2(%arg0: i32) -> (i32, i32) {
    %c0_i32 = arith.constant 0 : i32
    %c0_i32_0 = arith.constant 0 : i32
    %c0_i32_1 = arith.constant 0 : i32
    return %c0_i32, %c0_i32_0 : i32, i32
  }
  func.func @transform_3(%arg0: i32) -> (i32, i32) {
    %c0_i32 = arith.constant 0 : i32
    %c0_i32_0 = arith.constant 0 : i32
    return %arg0, %c0_i32 : i32, i32
  }
}

module attributes {stable_mosaic.version = 11 : i64} {
  func.func @_conv_mm_kernel(%arg0: i32, %arg1: memref<32x1024xbf16, #tpu.memory_space<vmem>>, %arg2: memref<1024x128xbf16, #tpu.memory_space<vmem>>, %arg3: memref<1x128xf32, #tpu.memory_space<vmem>>, %arg4: memref<32x128xbf16, #tpu.memory_space<vmem>>) attributes {dimension_semantics = [#tpu.dimension_semantics<parallel>], iteration_bounds = array<i64: 1>, scalar_prefetch = 0 : i64, scratch_operands = 0 : i64, tpu.core_type = #tpu.core_type<tc>, window_params = [{transform_indices = @transform_0, window_bounds = array<i64: 32, 1024>}, {pipeline_mode = #tpu.pipeline_mode<synchronous>, transform_indices = @transform_1, window_bounds = array<i64: 1024, 128>}, {pipeline_mode = #tpu.pipeline_mode<synchronous>, transform_indices = @transform_2, window_bounds = array<i64: 1, 128>}, {transform_indices = @transform_3, window_bounds = array<i64: 32, 128>}]} {
    %c0 = arith.constant 0 : index
    %c0_0 = arith.constant 0 : index
    %0 = vector.load %arg1[%c0, %c0_0] : memref<32x1024xbf16, #tpu.memory_space<vmem>>, vector<32x1024xbf16>
    %c0_1 = arith.constant 0 : index
    %c0_2 = arith.constant 0 : index
    %1 = vector.load %arg2[%c0_1, %c0_2] : memref<1024x128xbf16, #tpu.memory_space<vmem>>, vector<1024x128xbf16>
    %cst = arith.constant dense<0.000000e+00> : vector<32x128xf32>
    %2 = tpu.matmul %0, %1, %cst {dimension_numbers = #tpu.dot_dimension_numbers<[1], [0], [0], [1], [0, 0, 1, 1], [], []>} : vector<32x1024xbf16>, vector<1024x128xbf16>, vector<32x128xf32> -> vector<32x128xf32>
    %c0_3 = arith.constant 0 : index
    %c0_4 = arith.constant 0 : index
    %3 = vector.load %arg3[%c0_3, %c0_4] : memref<1x128xf32, #tpu.memory_space<vmem>>, vector<1x128xf32>
    %4 = vector.broadcast %3 : vector<1x128xf32> to vector<32x128xf32>
    %5 = arith.addf %2, %4 : vector<32x128xf32>
    %cst_5 = arith.constant 0.000000e+00 : f32
    %6 = vector.broadcast %cst_5 : f32 to vector<32x128xf32>
    %7 = arith.maximumf %5, %6 : vector<32x128xf32>
    %8 = arith.truncf %7 : vector<32x128xf32> to vector<32x128xbf16>
    %c0_6 = arith.constant 0 : index
    %c0_7 = arith.constant 0 : index
    %9 = vector.load %arg4[%c0_6, %c0_7] : memref<32x128xbf16, #tpu.memory_space<vmem>>, vector<32x128xbf16>
    tpu.vector_store %arg4[%c0_6, %c0_7], %8 {strides = array<i32>} : memref<32x128xbf16, #tpu.memory_space<vmem>>, vector<32x128xbf16>,
    return
  }
  func.func @transform_0(%arg0: i32) -> (i32, i32) {
    %c0_i32 = arith.constant 0 : i32
    %c0_i32_0 = arith.constant 0 : i32
    return %arg0, %c0_i32 : i32, i32
  }
  func.func @transform_1(%arg0: i32) -> (i32, i32) {
    %c0_i32 = arith.constant 0 : i32
    %c0_i32_0 = arith.constant 0 : i32
    %c0_i32_1 = arith.constant 0 : i32
    return %c0_i32, %c0_i32_0 : i32, i32
  }
  func.func @transform_2(%arg0: i32) -> (i32, i32) {
    %c0_i32 = arith.constant 0 : i32
    %c0_i32_0 = arith.constant 0 : i32
    %c0_i32_1 = arith.constant 0 : i32
    return %c0_i32, %c0_i32_0 : i32, i32
  }
  func.func @transform_3(%arg0: i32) -> (i32, i32) {
    %c0_i32 = arith.constant 0 : i32
    %c0_i32_0 = arith.constant 0 : i32
    return %arg0, %c0_i32 : i32, i32
  }
}

module attributes {stable_mosaic.version = 11 : i64} {
  func.func @_head_kernel(%arg0: i32, %arg1: memref<16x2048xbf16, #tpu.memory_space<vmem>>, %arg2: memref<2048x40xbf16, #tpu.memory_space<vmem>>, %arg3: memref<1x40xf32, #tpu.memory_space<vmem>>, %arg4: memref<16x40xf32, #tpu.memory_space<vmem>>) attributes {dimension_semantics = [#tpu.dimension_semantics<parallel>], iteration_bounds = array<i64: 1>, scalar_prefetch = 0 : i64, scratch_operands = 0 : i64, tpu.core_type = #tpu.core_type<tc>, window_params = [{transform_indices = @transform_0, window_bounds = array<i64: 16, 2048>}, {pipeline_mode = #tpu.pipeline_mode<synchronous>, transform_indices = @transform_1, window_bounds = array<i64: 2048, 40>}, {pipeline_mode = #tpu.pipeline_mode<synchronous>, transform_indices = @transform_2, window_bounds = array<i64: 1, 40>}, {transform_indices = @transform_3, window_bounds = array<i64: 16, 40>}]} {
    %c0 = arith.constant 0 : index
    %c0_0 = arith.constant 0 : index
    %0 = vector.load %arg1[%c0, %c0_0] : memref<16x2048xbf16, #tpu.memory_space<vmem>>, vector<16x2048xbf16>
    %c0_1 = arith.constant 0 : index
    %c0_2 = arith.constant 0 : index
    %1 = vector.load %arg2[%c0_1, %c0_2] : memref<2048x40xbf16, #tpu.memory_space<vmem>>, vector<2048x40xbf16>
    %cst = arith.constant dense<0.000000e+00> : vector<16x40xf32>
    %2 = tpu.matmul %0, %1, %cst {dimension_numbers = #tpu.dot_dimension_numbers<[1], [0], [0], [1], [0, 0, 1, 1], [], []>} : vector<16x2048xbf16>, vector<2048x40xbf16>, vector<16x40xf32> -> vector<16x40xf32>
    %c0_3 = arith.constant 0 : index
    %c0_4 = arith.constant 0 : index
    %3 = vector.load %arg3[%c0_3, %c0_4] : memref<1x40xf32, #tpu.memory_space<vmem>>, vector<1x40xf32>
    %4 = vector.broadcast %3 : vector<1x40xf32> to vector<16x40xf32>
    %5 = arith.addf %2, %4 : vector<16x40xf32>
    %6 = tpu.iota {dimensions = array<i32: 1>} : vector<16x40xi32>
    %c20_i32 = arith.constant 20 : i32
    %7 = vector.broadcast %c20_i32 : i32 to vector<16x40xi32>
    %8 = arith.cmpi sge, %6, %7 : vector<16x40xi32>
    %cst_5 = arith.constant 0xFF800000 : f32
    %9 = vector.broadcast %cst_5 : f32 to vector<16x40xf32>
    %10 = arith.select %8, %5, %9 : vector<16x40xi1>, vector<16x40xf32>
    %cst_6 = arith.constant dense<0xFF800000> : vector<16xf32>
    %11 = vector.multi_reduction <maximumf>, %10, %cst_6 [1] : vector<16x40xf32> to vector<16xf32>
    %12 = vector.shape_cast %11 : vector<16xf32> to vector<16x1xf32>
    %13 = vector.broadcast %12 : vector<16x1xf32> to vector<16x40xf32>
    %14 = arith.subf %10, %13 : vector<16x40xf32>
    %15 = math.exp %14 : vector<16x40xf32>
    %cst_7 = arith.constant dense<0.000000e+00> : vector<16xf32>
    %16 = vector.multi_reduction <add>, %15, %cst_7 [1] : vector<16x40xf32> to vector<16xf32>
    %17 = vector.shape_cast %16 : vector<16xf32> to vector<16x1xf32>
    %18 = tpu.reciprocal %17 {approx = true} : vector<16x1xf32> -> vector<16x1xf32>
    %19 = vector.broadcast %18 : vector<16x1xf32> to vector<16x40xf32>
    %20 = arith.mulf %15, %19 : vector<16x40xf32>
    %cst_8 = arith.constant 2.000000e+01 : f32
    %21 = vector.broadcast %cst_8 : f32 to vector<16x40xf32>
    %22 = arith.mulf %20, %21 : vector<16x40xf32>
    %cst_9 = arith.constant 9.99999997E-7 : f32
    %23 = vector.broadcast %cst_9 : f32 to vector<16x40xf32>
    %24 = arith.addf %22, %23 : vector<16x40xf32>
    %25 = arith.select %8, %24, %5 : vector<16x40xi1>, vector<16x40xf32>
    %c0_10 = arith.constant 0 : index
    %c0_11 = arith.constant 0 : index
    %26 = vector.load %arg4[%c0_10, %c0_11] : memref<16x40xf32, #tpu.memory_space<vmem>>, vector<16x40xf32>
    tpu.vector_store %arg4[%c0_10, %c0_11], %25 {strides = array<i32>} : memref<16x40xf32, #tpu.memory_space<vmem>>, vector<16x40xf32>,
    return
  }
  func.func @transform_0(%arg0: i32) -> (i32, i32) {
    %c0_i32 = arith.constant 0 : i32
    %c0_i32_0 = arith.constant 0 : i32
    return %arg0, %c0_i32 : i32, i32
  }
  func.func @transform_1(%arg0: i32) -> (i32, i32) {
    %c0_i32 = arith.constant 0 : i32
    %c0_i32_0 = arith.constant 0 : i32
    %c0_i32_1 = arith.constant 0 : i32
    return %c0_i32, %c0_i32_0 : i32, i32
  }
  func.func @transform_2(%arg0: i32) -> (i32, i32) {
    %c0_i32 = arith.constant 0 : i32
    %c0_i32_0 = arith.constant 0 : i32
    %c0_i32_1 = arith.constant 0 : i32
    return %c0_i32, %c0_i32_0 : i32, i32
  }
  func.func @transform_3(%arg0: i32) -> (i32, i32) {
    %c0_i32 = arith.constant 0 : i32
    %c0_i32_0 = arith.constant 0 : i32
    return %arg0, %c0_i32 : i32, i32
  }
}

</mosaic_0001>

<bundles_post_ra>
// kernel: enc_forward.4
= control target key start
LH: loop header
LB: loop body
LE: loop exit
PB: predicated region body
PF: predicated region fallthrough
CT: control target
= control target key end

     0   :  { %s1006_s12 = smov 0   ;;  %s1176_s0 = inlined_call_operand.vmem [shape: bf16[512,48], index: 0, kind: input, shape index: {}]   ;;  %s1177_s1 = inlined_call_operand.vmem [shape: bf16[48,32], index: 1, kind: input, shape index: {}]   ;;  %s1178_s2 = inlined_call_operand.vmem [shape: f32[1,32], index: 2, kind: input, shape index: {}]   ;;  %s1179_s3 = inlined_call_operand.vmem [shape: bf16[512,32], index: 3, kind: output, shape index: {}]  }
   0x1 LB: > { %s777_s13 = sadd.s32 4294967295, %s984_s12   ;;  %p781_p0 = scmp.ge.s32.totalorder %s984_s12, 1  ;;  %s984_s12 = sphi %s1006_s12, %s13_s12  }
   0x2   : > { %p138_p1 = scmp.lt.s32.totalorder %s984_s12, 3 }
   0x4   : > { %p139_p2 = pnand %p781_p0, %p138_p1 }
   0x5   : > { %v959_v0 = vld [vmem:[%s1177_s1] sm:$0xff] (!%p139_p2)   ;;  %s782_s16 = sshll.u32 (!%p139_p2), %s777_s13, 5  ;;  %v960_v1 = vld [vmem:[%s1177_s1 + $0x8] sm:$0xff] (!%p139_p2)   ;;  %v961_v2 = vld [vmem:[%s1177_s1 + $0x10] sm:$0xff] (!%p139_p2)   ;;  %vm318_vm0 = vcmask (!%p139_p2), 392192   ;;  %vm688_vm1 = vcmask (!%p139_p2), 257024  }
   0x6   : > { %142 = sbr.rel (%p139_p2) target bundleno = 265 (0x109), region = 32  ;;  %p163_p3 = scmp.lt.s32.totalorder (!%p139_p2), %s782_s16, 63  ;;  %907 = vmatprep.subr.bf16.mxu0 (!%p139_p2), %v959_v0  ;;  %945 = vmatprep.subr.bf16.mxu1 (!%p139_p2), %v959_v0  ;;  %v1068_v19 = vld [vmem:[%s1178_s2] ss:$0 sm:$0xff] (!%p139_p2) }
   0x7   : > { %908 = vmatpush3.bf16.msra.mxu0 (!%p139_p2), %v959_v0  ;;  %948 = vmatpush3.bf16.msra.mxu1 (!%p139_p2), %v959_v0 }
   0x8   : > { %909 = vmatprep.subr.bf16.mxu0 (!%p139_p2), %v960_v1  ;;  %946 = vmatprep.subr.bf16.mxu1 (!%p139_p2), %v960_v1 }
   0xb   : > { %910 = vmatpush3.bf16.msra.mxu0 (!%p139_p2), %v960_v1  ;;  %949 = vmatpush3.bf16.msra.mxu1 (!%p139_p2), %v960_v1 }
   0xc   : > { %911 = vmatprep.subr.bf16.mxu0 (!%p139_p2), %v961_v2  ;;  %947 = vmatprep.subr.bf16.mxu1 (!%p139_p2), %v961_v2 }
   0xd   : > { %s1181_s16 = smov (!%p163_p3, %s782_s16), 63 }
   0xe   : > { %s783_s21 = sshll.u32 %s1181_s16, 2 }
   0xf   : > { %s1031_s24 = scalar_lea.vmem %s1176_s0, %s783_s21  ;;  %912 = vmatpush3.bf16.msra.mxu0 %v961_v2  ;;  %950 = vmatpush3.bf16.msra.mxu1 %v961_v2  ;;  %s1081_s29 = scalar_lea.vmem %s1179_s3, %s783_s21 }
  0x10   : > { %v962_v3 = vld [vmem:[%s1031_s24] sm:$0xff]   ;;  %v964_v5 = vld [vmem:[%s1031_s24 + $0x8] sm:$0xff]   ;;  %v966_v7 = vld [vmem:[%s1031_s24 + $0x10] sm:$0xff]  }
  0x11   : > { %v963_v4 = vld [vmem:[%s1031_s24 + $0x40] sm:$0xff]   ;;  %913 = vmatprep.mubr.msk.bf16.mxu0 %vm318_vm0, %v962_v3  ;;  %v965_v6 = vld [vmem:[%s1031_s24 + $0x48] sm:$0xff]   ;;  %v967_v8 = vld [vmem:[%s1031_s24 + $0x50] sm:$0xff]  }
  0x12   : > { %929 = vmatprep.mubr.msk.bf16.mxu1 %vm318_vm0, %v963_v4  ;;  %914 = vmatmul.mubr.msk.bf16.vlgmr.msra.gmra.mrb[0].mxu0 %vm318_vm0, %v964_v5  ;;  %v968_v9 = vld [vmem:[%s1031_s24 + $0x18] sm:$0xff]   ;;  %v970_v11 = vld [vmem:[%s1031_s24 + $0x20] sm:$0xff]   ;;  %v972_v13 = vld [vmem:[%s1031_s24 + $0x28] sm:$0xff]  }
  0x13   : > { %930 = vmatmul.mubr.msk.bf16.vlgmr.msra.gmra.mrb[0].mxu1 %vm318_vm0, %v965_v6  ;;  %917 = vmatprep.mubr.msk.bf16.mxu0 %vm318_vm0, %v966_v7  ;;  %v969_v10 = vld [vmem:[%s1031_s24 + $0x58] sm:$0xff]   ;;  %v971_v12 = vld [vmem:[%s1031_s24 + $0x60] sm:$0xff]   ;;  %v973_v14 = vld [vmem:[%s1031_s24 + $0x68] sm:$0xff]  }
  0x14   : > { %933 = vmatprep.mubr.msk.bf16.mxu1 %vm318_vm0, %v967_v8  ;;  %v974_v15 = vld [vmem:[%s1031_s24 + $0x30] sm:$0xff]   ;;  %v976_v17 = vld [vmem:[%s1031_s24 + $0x38] sm:$0xff]  }
  0x15   : > { %v975_v16 = vld [vmem:[%s1031_s24 + $0x70] sm:$0xff]   ;;  %v977_v18 = vld [vmem:[%s1031_s24 + $0x78] sm:$0xff]  }
  0x1a   : > { %918 = vmatmul.mubr.msk.bf16.gmra.mrb[4].mxu0 %vm318_vm0, %v968_v9 }
  0x1b   : > { %934 = vmatmul.mubr.msk.bf16.gmra.mrb[4].mxu1 %vm318_vm0, %v969_v10  ;;  %921 = vmatprep.mubr.msk.bf16.mxu0 %vm318_vm0, %v970_v11 }
  0x1c   : > { %937 = vmatprep.mubr.msk.bf16.mxu1 %vm318_vm0, %v971_v12 }
  0x22   : > { %922 = vmatmul.mubr.msk.bf16.gmra.mrb[8].mxu0 %vm318_vm0, %v972_v13 }
  0x23   : > { %938 = vmatmul.mubr.msk.bf16.gmra.mrb[8].mxu1 %vm318_vm0, %v973_v14  ;;  %925 = vmatprep.mubr.msk.bf16.mxu0 %vm318_vm0, %v974_v15 }
  0x24   : > { %941 = vmatprep.mubr.msk.bf16.mxu1 %vm318_vm0, %v975_v16 }
  0x2a   : > { %926 = vmatmul.mubr.msk.bf16.gmra.mrb[12].mxu0 %vm318_vm0, %v976_v17 }
  0x2b   : > { %942 = vmatmul.mubr.msk.bf16.gmra.mrb[12].mxu1 %vm318_vm0, %v977_v18 }
  0xe5   : > { %v915_v20 = vpop.f32.mrb[0].mxu0 }
  0xe6   : > { %v931_v21 = vpop.f32.mrb[0].mxu1  ;;  %v410_v22 = vadd.f32 %v915_v20, %v1068_v19  ;;  %v401_v24 = vpop.f32.mrb[1].mxu0 }
  0xe7   : > { %v474_v23 = vadd.f32 %v931_v21, %v1068_v19  ;;  %v465_v25 = vpop.f32.mrb[1].mxu1  ;;  %v402_v26 = vadd.f32 %v1068_v19, %v401_v24  ;;  %v916_v28 = vpop.f32.mrb[2].mxu0 }
  0xe8   : > { %v466_v27 = vadd.f32 %v1068_v19, %v465_v25  ;;  %v932_v29 = vpop.f32.mrb[2].mxu1  ;;  %v530_v30 = vmax.f32 %v410_v22, 0.0  ;;  %v413_v32 = vadd.f32 %v916_v28, %v1068_v19  ;;  %v404_v34 = vpop.f32.mrb[3].mxu0 }
  0xe9   : > { %v546_v31 = vmax.f32 %v474_v23, 0.0  ;;  %v477_v33 = vadd.f32 %v932_v29, %v1068_v19  ;;  %v468_v35 = vpop.f32.mrb[3].mxu1  ;;  %v528_v36 = vmax.f32 %v402_v26, 0.0  ;;  %v405_v38 = vadd.f32 %v1068_v19, %v404_v34 }
  0xea   : > { %v544_v37 = vmax.f32 %v466_v27, 0.0  ;;  %v469_v39 = vadd.f32 %v1068_v19, %v468_v35  ;;  %v858_v40 = vpack.c.bf16 %v530_v30, %v530_v30  ;;  %v531_v42 = vmax.f32 %v413_v32, 0.0 }
  0xeb   : > { %v874_v41 = vpack.c.bf16 %v546_v31, %v546_v31  ;;  %v547_v43 = vmax.f32 %v477_v33, 0.0  ;;  %v856_v44 = vpack.c.bf16 %v528_v36, %v528_v36  ;;  %v529_v46 = vmax.f32 %v405_v38, 0.0 }
  0xec   : > { %v872_v45 = vpack.c.bf16 %v544_v37, %v544_v37  ;;  %v545_v47 = vmax.f32 %v469_v39, 0.0  ;;  %691 = vst.msk [vmem:[%s1081_s29 + $0x8] sm:$0xf] %vm688_vm1, %v858_v40  ;;  %v859_v48 = vpack.c.bf16 %v531_v42, %v531_v42 }
  0xed   : > { %707 = vst.msk [vmem:[%s1081_s29 + $0x48] sm:$0xf] %vm688_vm1, %v874_v41  ;;  %v875_v49 = vpack.c.bf16 %v547_v43, %v547_v43  ;;  %689 = vst.msk [vmem:[%s1081_s29] sm:$0xf] %vm688_vm1, %v856_v44  ;;  %v857_v50 = vpack.c.bf16 %v529_v46, %v529_v46  ;;  %v919_v52 = vpop.f32.mrb[4].mxu0 }
  0xee   : > { %705 = vst.msk [vmem:[%s1081_s29 + $0x40] sm:$0xf] %vm688_vm1, %v872_v45  ;;  %v873_v51 = vpack.c.bf16 %v545_v47, %v545_v47  ;;  %v935_v53 = vpop.f32.mrb[4].mxu1  ;;  %692 = vst.msk [vmem:[%s1081_s29 + $0xc] sm:$0xf] %vm688_vm1, %v859_v48  ;;  %v426_v54 = vadd.f32 %v919_v52, %v1068_v19  ;;  %v417_v56 = vpop.f32.mrb[5].mxu0 }
  0xef   : > { %708 = vst.msk [vmem:[%s1081_s29 + $0x4c] sm:$0xf] %vm688_vm1, %v875_v49  ;;  %v490_v55 = vadd.f32 %v935_v53, %v1068_v19  ;;  %v481_v57 = vpop.f32.mrb[5].mxu1  ;;  %690 = vst.msk [vmem:[%s1081_s29 + $0x4] sm:$0xf] %vm688_vm1, %v857_v50  ;;  %v418_v58 = vadd.f32 %v1068_v19, %v417_v56  ;;  %v920_v60 = vpop.f32.mrb[6].mxu0 }
  0xf0   : > { %706 = vst.msk [vmem:[%s1081_s29 + $0x44] sm:$0xf] %vm688_vm1, %v873_v51  ;;  %v482_v59 = vadd.f32 %v1068_v19, %v481_v57  ;;  %v936_v61 = vpop.f32.mrb[6].mxu1  ;;  %v534_v62 = vmax.f32 %v426_v54, 0.0  ;;  %v429_v0 = vadd.f32 %v920_v60, %v1068_v19  ;;  %v420_v2 = vpop.f32.mrb[7].mxu0 }
  0xf1   : > { %v550_v63 = vmax.f32 %v490_v55, 0.0  ;;  %v493_v1 = vadd.f32 %v936_v61, %v1068_v19  ;;  %v484_v3 = vpop.f32.mrb[7].mxu1  ;;  %v532_v4 = vmax.f32 %v418_v58, 0.0  ;;  %v421_v6 = vadd.f32 %v1068_v19, %v420_v2 }
  0xf2   : > { %v548_v5 = vmax.f32 %v482_v59, 0.0  ;;  %v485_v7 = vadd.f32 %v1068_v19, %v484_v3  ;;  %v862_v8 = vpack.c.bf16 %v534_v62, %v534_v62  ;;  %v535_v10 = vmax.f32 %v429_v0, 0.0 }
  0xf3   : > { %v878_v9 = vpack.c.bf16 %v550_v63, %v550_v63  ;;  %v551_v11 = vmax.f32 %v493_v1, 0.0  ;;  %v860_v12 = vpack.c.bf16 %v532_v4, %v532_v4  ;;  %v533_v14 = vmax.f32 %v421_v6, 0.0 }
  0xf4   : > { %v876_v13 = vpack.c.bf16 %v548_v5, %v548_v5  ;;  %v549_v15 = vmax.f32 %v485_v7, 0.0  ;;  %695 = vst.msk [vmem:[%s1081_s29 + $0x18] sm:$0xf] %vm688_vm1, %v862_v8  ;;  %v863_v16 = vpack.c.bf16 %v535_v10, %v535_v10 }
  0xf5   : > { %711 = vst.msk [vmem:[%s1081_s29 + $0x58] sm:$0xf] %vm688_vm1, %v878_v9  ;;  %v879_v17 = vpack.c.bf16 %v551_v11, %v551_v11  ;;  %693 = vst.msk [vmem:[%s1081_s29 + $0x10] sm:$0xf] %vm688_vm1, %v860_v12  ;;  %v861_v18 = vpack.c.bf16 %v533_v14, %v533_v14  ;;  %v923_v21 = vpop.f32.mrb[8].mxu0 }
  0xf6   : > { %709 = vst.msk [vmem:[%s1081_s29 + $0x50] sm:$0xf] %vm688_vm1, %v876_v13  ;;  %v877_v20 = vpack.c.bf16 %v549_v15, %v549_v15  ;;  %v939_v22 = vpop.f32.mrb[8].mxu1  ;;  %696 = vst.msk [vmem:[%s1081_s29 + $0x1c] sm:$0xf] %vm688_vm1, %v863_v16  ;;  %v442_v23 = vadd.f32 %v923_v21, %v1068_v19  ;;  %v433_v25 = vpop.f32.mrb[9].mxu0 }
  0xf7   : > { %712 = vst.msk [vmem:[%s1081_s29 + $0x5c] sm:$0xf] %vm688_vm1, %v879_v17  ;;  %v506_v24 = vadd.f32 %v939_v22, %v1068_v19  ;;  %v497_v26 = vpop.f32.mrb[9].mxu1  ;;  %694 = vst.msk [vmem:[%s1081_s29 + $0x14] sm:$0xf] %vm688_vm1, %v861_v18  ;;  %v434_v27 = vadd.f32 %v1068_v19, %v433_v25  ;;  %v924_v29 = vpop.f32.mrb[10].mxu0 }
  0xf8   : > { %710 = vst.msk [vmem:[%s1081_s29 + $0x54] sm:$0xf] %vm688_vm1, %v877_v20  ;;  %v498_v28 = vadd.f32 %v1068_v19, %v497_v26  ;;  %v940_v30 = vpop.f32.mrb[10].mxu1  ;;  %v538_v31 = vmax.f32 %v442_v23, 0.0  ;;  %v445_v33 = vadd.f32 %v924_v29, %v1068_v19  ;;  %v436_v35 = vpop.f32.mrb[11].mxu0 }
  0xf9   : > { %v554_v32 = vmax.f32 %v506_v24, 0.0  ;;  %v509_v34 = vadd.f32 %v940_v30, %v1068_v19  ;;  %v500_v36 = vpop.f32.mrb[11].mxu1  ;;  %v536_v37 = vmax.f32 %v434_v27, 0.0  ;;  %v437_v39 = vadd.f32 %v1068_v19, %v436_v35 }
  0xfa   : > { %v552_v38 = vmax.f32 %v498_v28, 0.0  ;;  %v501_v40 = vadd.f32 %v1068_v19, %v500_v36  ;;  %v866_v41 = vpack.c.bf16 %v538_v31, %v538_v31  ;;  %v539_v43 = vmax.f32 %v445_v33, 0.0 }
  0xfb   : > { %v882_v42 = vpack.c.bf16 %v554_v32, %v554_v32  ;;  %v555_v44 = vmax.f32 %v509_v34, 0.0  ;;  %v864_v45 = vpack.c.bf16 %v536_v37, %v536_v37  ;;  %v537_v47 = vmax.f32 %v437_v39, 0.0 }
  0xfc   : > { %v880_v46 = vpack.c.bf16 %v552_v38, %v552_v38  ;;  %v553_v48 = vmax.f32 %v501_v40, 0.0  ;;  %699 = vst.msk [vmem:[%s1081_s29 + $0x28] sm:$0xf] %vm688_vm1, %v866_v41  ;;  %v867_v49 = vpack.c.bf16 %v539_v43, %v539_v43 }
  0xfd   : > { %715 = vst.msk [vmem:[%s1081_s29 + $0x68] sm:$0xf] %vm688_vm1, %v882_v42  ;;  %v883_v50 = vpack.c.bf16 %v555_v44, %v555_v44  ;;  %697 = vst.msk [vmem:[%s1081_s29 + $0x20] sm:$0xf] %vm688_vm1, %v864_v45  ;;  %v865_v51 = vpack.c.bf16 %v537_v47, %v537_v47  ;;  %v927_v53 = vpop.f32.mrb[12].mxu0 }
  0xfe   : > { %713 = vst.msk [vmem:[%s1081_s29 + $0x60] sm:$0xf] %vm688_vm1, %v880_v46  ;;  %v881_v52 = vpack.c.bf16 %v553_v48, %v553_v48  ;;  %v943_v54 = vpop.f32.mrb[12].mxu1  ;;  %700 = vst.msk [vmem:[%s1081_s29 + $0x2c] sm:$0xf] %vm688_vm1, %v867_v49  ;;  %v458_v55 = vadd.f32 %v927_v53, %v1068_v19  ;;  %v449_v57 = vpop.f32.mrb[13].mxu0 }
  0xff   : > { %716 = vst.msk [vmem:[%s1081_s29 + $0x6c] sm:$0xf] %vm688_vm1, %v883_v50  ;;  %v522_v56 = vadd.f32 %v943_v54, %v1068_v19  ;;  %v513_v58 = vpop.f32.mrb[13].mxu1  ;;  %698 = vst.msk [vmem:[%s1081_s29 + $0x24] sm:$0xf] %vm688_vm1, %v865_v51  ;;  %v450_v59 = vadd.f32 %v1068_v19, %v449_v57  ;;  %v928_v61 = vpop.f32.mrb[14].mxu0 }
 0x100   : > { %714 = vst.msk [vmem:[%s1081_s29 + $0x64] sm:$0xf] %vm688_vm1, %v881_v52  ;;  %v514_v60 = vadd.f32 %v1068_v19, %v513_v58  ;;  %v944_v62 = vpop.f32.mrb[14].mxu1  ;;  %v542_v63 = vmax.f32 %v458_v55, 0.0  ;;  %v461_v1 = vadd.f32 %v928_v61, %v1068_v19  ;;  %v452_v3 = vpop.f32.mrb[15].mxu0 }
 0x101   : > { %v558_v0 = vmax.f32 %v522_v56, 0.0  ;;  %v525_v2 = vadd.f32 %v944_v62, %v1068_v19  ;;  %v516_v4 = vpop.f32.mrb[15].mxu1  ;;  %v540_v5 = vmax.f32 %v450_v59, 0.0  ;;  %v453_v7 = vadd.f32 %v1068_v19, %v452_v3 }
 0x102   : > { %v556_v6 = vmax.f32 %v514_v60, 0.0  ;;  %v517_v8 = vadd.f32 %v1068_v19, %v516_v4  ;;  %v870_v9 = vpack.c.bf16 %v542_v63, %v542_v63  ;;  %v543_v11 = vmax.f32 %v461_v1, 0.0 }
 0x103   : > { %v886_v10 = vpack.c.bf16 %v558_v0, %v558_v0  ;;  %v559_v12 = vmax.f32 %v525_v2, 0.0  ;;  %v868_v13 = vpack.c.bf16 %v540_v5, %v540_v5  ;;  %v541_v15 = vmax.f32 %v453_v7, 0.0 }
 0x104   : > { %v884_v14 = vpack.c.bf16 %v556_v6, %v556_v6  ;;  %v557_v16 = vmax.f32 %v517_v8, 0.0  ;;  %703 = vst.msk [vmem:[%s1081_s29 + $0x38] sm:$0xf] %vm688_vm1, %v870_v9  ;;  %v871_v17 = vpack.c.bf16 %v543_v11, %v543_v11 }
 0x105   : > { %719 = vst.msk [vmem:[%s1081_s29 + $0x78] sm:$0xf] %vm688_vm1, %v886_v10  ;;  %v887_v18 = vpack.c.bf16 %v559_v12, %v559_v12  ;;  %701 = vst.msk [vmem:[%s1081_s29 + $0x30] sm:$0xf] %vm688_vm1, %v868_v13  ;;  %v869_v19 = vpack.c.bf16 %v541_v15, %v541_v15 }
 0x106   : > { %717 = vst.msk [vmem:[%s1081_s29 + $0x70] sm:$0xf] %vm688_vm1, %v884_v14  ;;  %v885_v20 = vpack.c.bf16 %v557_v16, %v557_v16  ;;  %704 = vst.msk [vmem:[%s1081_s29 + $0x3c] sm:$0xf] %vm688_vm1, %v871_v17 }
 0x107   : > { %720 = vst.msk [vmem:[%s1081_s29 + $0x7c] sm:$0xf] %vm688_vm1, %v887_v18  ;;  %702 = vst.msk [vmem:[%s1081_s29 + $0x34] sm:$0xf] %vm688_vm1, %v869_v19 }
 0x108   : > { %718 = vst.msk [vmem:[%s1081_s29 + $0x74] sm:$0xf] %vm688_vm1, %v885_v20 }
 0x109 PF: > { %s13_s12 = sadd.s32 1, %s984_s12  }
 0x10a   : > { %p10_p4 = scmp.ge.s32.totalorder %s13_s12, 4  }
 0x10c   :  { %12 = sbr.rel (!%p10_p4) target bundleno = 1 (0x1), region = 62 }

// kernel: enc_forward.5
= control target key start
LH: loop header
LB: loop body
LE: loop exit
PB: predicated region body
PF: predicated region fallthrough
CT: control target
= control target key end

     0   :  { %vm744_vm0 = vcmask 519168   ;;  %s1367_s1 = inlined_call_operand.vmem [shape: bf16[512,64], index: 1, kind: input, shape index: {}]   ;;  %s1368_s0 = inlined_call_operand.vmem [shape: bf16[128,512], index: 0, kind: input, shape index: {}]   ;;  %s1369_s2 = inlined_call_operand.vmem [shape: f32[1,64], index: 2, kind: input, shape index: {}]   ;;  %s1370_s3 = inlined_call_operand.vmem [shape: bf16[128,64], index: 3, kind: output, shape index: {}]  }
   0x1   :  { %v990_v0 = vld [vmem:[%s1367_s1 + $0x40] sm:$0xff]   ;;  %v994_v4 = vld [vmem:[%s1367_s1 + $0x48] sm:$0xff]   ;;  %v998_v8 = vld [vmem:[%s1367_s1 + $0x50] sm:$0xff]  }
   0x2   :  { %v991_v1 = vld [vmem:[%s1367_s1 + $0xc0] sm:$0xff]   ;;  %862 = vmatprep.subr.bf16.mxu0 %v990_v0  ;;  %v995_v5 = vld [vmem:[%s1367_s1 + $0xc8] sm:$0xff]   ;;  %v999_v9 = vld [vmem:[%s1367_s1 + $0xd0] sm:$0xff]  }
   0x3   :  { %v992_v2 = vld [vmem:[%s1367_s1] sm:$0xff]   ;;  %926 = vmatprep.subr.bf16.mxu1 %v991_v1  ;;  %v996_v6 = vld [vmem:[%s1367_s1 + $0x8] sm:$0xff]   ;;  %v1000_v10 = vld [vmem:[%s1367_s1 + $0x10] sm:$0xff]  }
   0x4   :  { %v993_v3 = vld [vmem:[%s1367_s1 + $0x80] sm:$0xff]   ;;  %863 = vmatpush3.bf16.msra.mxu0 %v992_v2  ;;  %v997_v7 = vld [vmem:[%s1367_s1 + $0x88] sm:$0xff]   ;;  %v1001_v11 = vld [vmem:[%s1367_s1 + $0x90] sm:$0xff]  }
   0x5   :  { %927 = vmatpush3.bf16.msra.mxu1 %v993_v3  ;;  %864 = vmatprep.subr.bf16.mxu0 %v994_v4  ;;  %v1002_v12 = vld [vmem:[%s1367_s1 + $0x58] sm:$0xff]   ;;  %v1006_v16 = vld [vmem:[%s1367_s1 + $0x60] sm:$0xff]   ;;  %v1010_v20 = vld [vmem:[%s1367_s1 + $0x68] sm:$0xff]  }
   0x6   :  { %928 = vmatprep.subr.bf16.mxu1 %v995_v5  ;;  %v1003_v13 = vld [vmem:[%s1367_s1 + $0xd8] sm:$0xff]   ;;  %v1007_v17 = vld [vmem:[%s1367_s1 + $0xe0] sm:$0xff]   ;;  %v1011_v21 = vld [vmem:[%s1367_s1 + $0xe8] sm:$0xff]  }
   0x7   :  { %v1004_v14 = vld [vmem:[%s1367_s1 + $0x18] sm:$0xff]   ;;  %v1008_v18 = vld [vmem:[%s1367_s1 + $0x20] sm:$0xff]   ;;  %v1012_v22 = vld [vmem:[%s1367_s1 + $0x28] sm:$0xff]  }
   0x8   :  { %865 = vmatpush3.bf16.msra.mxu0 %v996_v6  ;;  %v1005_v15 = vld [vmem:[%s1367_s1 + $0x98] sm:$0xff]   ;;  %v1009_v19 = vld [vmem:[%s1367_s1 + $0xa0] sm:$0xff]   ;;  %v1013_v23 = vld [vmem:[%s1367_s1 + $0xa8] sm:$0xff]  }
   0x9   :  { %929 = vmatpush3.bf16.msra.mxu1 %v997_v7  ;;  %866 = vmatprep.subr.bf16.mxu0 %v998_v8  ;;  %v1014_v24 = vld [vmem:[%s1367_s1 + $0x70] sm:$0xff]   ;;  %v1018_v28 = vld [vmem:[%s1367_s1 + $0x78] sm:$0xff]   ;;  %v1285_v2 = vld [vmem:[%s1369_s2] ss:$0 sm:$0xff] }
   0xa   :  { %930 = vmatprep.subr.bf16.mxu1 %v999_v9  ;;  %v1015_v25 = vld [vmem:[%s1367_s1 + $0xf0] sm:$0xff]   ;;  %v1019_v29 = vld [vmem:[%s1367_s1 + $0xf8] sm:$0xff]  }
   0xb   :  { %v1016_v26 = vld [vmem:[%s1367_s1 + $0x30] sm:$0xff]   ;;  %v1020_v30 = vld [vmem:[%s1367_s1 + $0x38] sm:$0xff]  }
   0xc   :  { %867 = vmatpush3.bf16.msra.mxu0 %v1000_v10  ;;  %v1017_v27 = vld [vmem:[%s1367_s1 + $0xb0] sm:$0xff]   ;;  %v1021_v31 = vld [vmem:[%s1367_s1 + $0xb8] sm:$0xff]  }
   0xd   :  { %931 = vmatpush3.bf16.msra.mxu1 %v1001_v11  ;;  %868 = vmatprep.subr.bf16.mxu0 %v1002_v12  ;;  %v1022_v32 = vld [vmem:[%s1368_s0] ss:$16 sps:$4 sm:$0xff]   ;;  %v1024_v33 = vld [vmem:[%s1368_s0 + $0x4] ss:$16 sps:$4 sm:$0xff]   ;;  %v1025_v34 = vld [vmem:[%s1368_s0 + $0x8] ss:$16 sps:$4 sm:$0xff]  }
   0xe   :  { %932 = vmatprep.subr.bf16.mxu1 %v1003_v13  ;;  %v1027_v35 = vld [vmem:[%s1368_s0 + $0xc] ss:$16 sps:$4 sm:$0xff]   ;;  %502 = vmatprep.mubr.bf16.mxu0 %v1024_v33  ;;  %v1028_v36 = vld [vmem:[%s1368_s0 + $0x24] ss:$16 sps:$4 sm:$0xff]   ;;  %v1032_v38 = vld [vmem:[%s1368_s0 + $0x20] ss:$16 sps:$4 sm:$0xff]  }
   0xf   :  { %599 = vmatprep.mubr.bf16.mxu1 %v1027_v35  ;;  %v1030_v37 = vld [vmem:[%s1368_s0 + $0x2c] ss:$16 sps:$4 sm:$0xff]   ;;  %v1033_v39 = vld [vmem:[%s1368_s0 + $0x28] ss:$16 sps:$4 sm:$0xff]   ;;  %v1034_v40 = vld [vmem:[%s1368_s0 + $0x44] ss:$16 sps:$4 sm:$0xff]  }
  0x10   :  { %869 = vmatpush3.bf16.msra.mxu0 %v1004_v14  ;;  %v1036_v41 = vld [vmem:[%s1368_s0 + $0x4c] ss:$16 sps:$4 sm:$0xff]   ;;  %v1038_v42 = vld [vmem:[%s1368_s0 + $0x40] ss:$16 sps:$4 sm:$0xff]   ;;  %v1039_v43 = vld [vmem:[%s1368_s0 + $0x48] ss:$16 sps:$4 sm:$0xff]  }
  0x11   :  { %933 = vmatpush3.bf16.msra.mxu1 %v1005_v15  ;;  %870 = vmatprep.subr.bf16.mxu0 %v1006_v16  ;;  %v1040_v44 = vld [vmem:[%s1368_s0 + $0x64] ss:$16 sps:$4 sm:$0xff]   ;;  %v1042_v45 = vld [vmem:[%s1368_s0 + $0x6c] ss:$16 sps:$4 sm:$0xff]   ;;  %v1044_v46 = vld [vmem:[%s1368_s0 + $0x60] ss:$16 sps:$4 sm:$0xff]  }
  0x12   :  { %934 = vmatprep.subr.bf16.mxu1 %v1007_v17  ;;  %v1045_v47 = vld [vmem:[%s1368_s0 + $0x68] ss:$16 sps:$4 sm:$0xff]   ;;  %v1046_v48 = vld [vmem:[%s1368_s0 + $0x84] ss:$16 sps:$4 sm:$0xff]   ;;  %v1048_v49 = vld [vmem:[%s1368_s0 + $0x8c] ss:$16 sps:$4 sm:$0xff]  }
  0x13   :  { %v1050_v50 = vld [vmem:[%s1368_s0 + $0x80] ss:$16 sps:$4 sm:$0xff]   ;;  %v1051_v51 = vld [vmem:[%s1368_s0 + $0x88] ss:$16 sps:$4 sm:$0xff]   ;;  %v1052_v52 = vld [vmem:[%s1368_s0 + $0xa4] ss:$16 sps:$4 sm:$0xff]  }
  0x14   :  { %871 = vmatpush3.bf16.msra.mxu0 %v1008_v18  ;;  %v1054_v53 = vld [vmem:[%s1368_s0 + $0xac] ss:$16 sps:$4 sm:$0xff]   ;;  %v1056_v54 = vld [vmem:[%s1368_s0 + $0xa0] ss:$16 sps:$4 sm:$0xff]   ;;  %v1057_v55 = vld [vmem:[%s1368_s0 + $0xa8] ss:$16 sps:$4 sm:$0xff]  }
  0x15   :  { %935 = vmatpush3.bf16.msra.mxu1 %v1009_v19  ;;  %872 = vmatprep.subr.bf16.mxu0 %v1010_v20  ;;  %v1058_v56 = vld [vmem:[%s1368_s0 + $0xc4] ss:$16 sps:$4 sm:$0xff]   ;;  %v1060_v57 = vld [vmem:[%s1368_s0 + $0xcc] ss:$16 sps:$4 sm:$0xff]   ;;  %v1062_v58 = vld [vmem:[%s1368_s0 + $0xc0] ss:$16 sps:$4 sm:$0xff]  }
  0x16   :  { %936 = vmatprep.subr.bf16.mxu1 %v1011_v21  ;;  %v1063_v59 = vld [vmem:[%s1368_s0 + $0xc8] ss:$16 sps:$4 sm:$0xff]   ;;  %v1064_v60 = vld [vmem:[%s1368_s0 + $0xe4] ss:$16 sps:$4 sm:$0xff]   ;;  %v1066_v61 = vld [vmem:[%s1368_s0 + $0xec] ss:$16 sps:$4 sm:$0xff]  }
  0x17   :  { %v1068_v62 = vld [vmem:[%s1368_s0 + $0xe0] ss:$16 sps:$4 sm:$0xff]   ;;  %v1069_v63 = vld [vmem:[%s1368_s0 + $0xe8] ss:$16 sps:$4 sm:$0xff]  }
  0x18   :  { %873 = vmatpush3.bf16.msra.mxu0 %v1012_v22 }
  0x19   :  { %937 = vmatpush3.bf16.msra.mxu1 %v1013_v23  ;;  %874 = vmatprep.subr.bf16.mxu0 %v1014_v24 }
  0x1a   :  { %938 = vmatprep.subr.bf16.mxu1 %v1015_v25 }
  0x1c   :  { %875 = vmatpush3.bf16.msra.mxu0 %v1016_v26 }
  0x1d   :  { %939 = vmatpush3.bf16.msra.mxu1 %v1017_v27  ;;  %876 = vmatprep.subr.bf16.mxu0 %v1018_v28 }
  0x1e   :  { %940 = vmatprep.subr.bf16.mxu1 %v1019_v29 }
  0x20   :  { %877 = vmatpush3.bf16.msra.mxu0 %v1020_v30 }
  0x21   :  { %941 = vmatpush3.bf16.msra.mxu1 %v1021_v31 }
  0x23   :  { %503 = vmatmul.mubr.bf16.vlgmr.msra.gmra.mrb[0].mxu0 %v1022_v32 }
  0x24   :  { %600 = vmatmul.mubr.bf16.vlgmr.msra.gmra.mrb[0].mxu1 %v1025_v34  ;;  %510 = vmatprep.mubr.bf16.mxu0 %v1028_v36 }
  0x25   :  { %607 = vmatprep.mubr.bf16.mxu1 %v1030_v37 }
  0x2b   :  { %511 = vmatmul.mubr.bf16.gmra.mrb[4].mxu0 %v1032_v38 }
  0x2c   :  { %608 = vmatmul.mubr.bf16.gmra.mrb[4].mxu1 %v1033_v39  ;;  %518 = vmatprep.mubr.bf16.mxu0 %v1034_v40 }
  0x2d   :  { %615 = vmatprep.mubr.bf16.mxu1 %v1036_v41 }
  0x33   :  { %519 = vmatmul.mubr.bf16.gmra.mrb[8].mxu0 %v1038_v42 }
  0x34   :  { %616 = vmatmul.mubr.bf16.gmra.mrb[8].mxu1 %v1039_v43  ;;  %526 = vmatprep.mubr.bf16.mxu0 %v1040_v44 }
  0x35   :  { %623 = vmatprep.mubr.bf16.mxu1 %v1042_v45 }
  0x3b   :  { %527 = vmatmul.mubr.bf16.gmra.mrb[12].mxu0 %v1044_v46 }
  0x3c   :  { %624 = vmatmul.mubr.bf16.gmra.mrb[12].mxu1 %v1045_v47  ;;  %534 = vmatprep.mubr.bf16.mxu0 %v1046_v48 }
  0x3d   :  { %631 = vmatprep.mubr.bf16.mxu1 %v1048_v49 }
  0x43   :  { %535 = vmatmul.mubr.bf16.gmra.mrb[16].mxu0 %v1050_v50 }
  0x44   :  { %632 = vmatmul.mubr.bf16.gmra.mrb[16].mxu1 %v1051_v51  ;;  %542 = vmatprep.mubr.bf16.mxu0 %v1052_v52 }
  0x45   :  { %639 = vmatprep.mubr.bf16.mxu1 %v1054_v53 }
  0x4b   :  { %543 = vmatmul.mubr.bf16.gmra.mrb[20].mxu0 %v1056_v54 }
  0x4c   :  { %640 = vmatmul.mubr.bf16.gmra.mrb[20].mxu1 %v1057_v55  ;;  %550 = vmatprep.mubr.bf16.mxu0 %v1058_v56 }
  0x4d   :  { %647 = vmatprep.mubr.bf16.mxu1 %v1060_v57 }
  0x53   :  { %551 = vmatmul.mubr.bf16.gmra.mrb[24].mxu0 %v1062_v58 }
  0x54   :  { %648 = vmatmul.mubr.bf16.gmra.mrb[24].mxu1 %v1063_v59  ;;  %558 = vmatprep.mubr.bf16.mxu0 %v1064_v60 }
  0x55   :  { %655 = vmatprep.mubr.bf16.mxu1 %v1066_v61 }
  0x5b   :  { %559 = vmatmul.mubr.bf16.gmra.mrb[28].mxu0 %v1068_v62 }
  0x5c   :  { %656 = vmatmul.mubr.bf16.gmra.mrb[28].mxu1 %v1069_v63 }
  0xf6   :  { %v878_v0 = vpop.f32.mrb[0].mxu0 }
  0xf7   :  { %v942_v1 = vpop.f32.mrb[0].mxu1  ;;  %v879_v3 = vpop.f32.mrb[1].mxu0 }
  0xf8   :  { %v880_v4 = vadd.f32 %v879_v3, %v878_v0  ;;  %v943_v5 = vpop.f32.mrb[1].mxu1  ;;  %v881_v6 = vpop.f32.mrb[2].mxu0 }
  0xf9   :  { %v944_v7 = vadd.f32 %v943_v5, %v942_v1  ;;  %v945_v8 = vpop.f32.mrb[2].mxu1  ;;  %v882_v9 = vpop.f32.mrb[3].mxu0 }
  0xfa   :  { %v505_v10 = vadd.f32 %v880_v4, %v1285_v2  ;;  %v883_v11 = vadd.f32 %v882_v9, %v881_v6  ;;  %v946_v12 = vpop.f32.mrb[3].mxu1 }
  0xfb   :  { %v947_v13 = vadd.f32 %v946_v12, %v945_v8 }
  0xfc   :  { %v602_v14 = vadd.f32 %v944_v7, %v505_v10  ;;  %v508_v15 = vadd.f32 %v883_v11, %v1285_v2 }
  0xfe   :  { %v664_v16 = vmax.f32 %v602_v14, 0.0  ;;  %v605_v17 = vadd.f32 %v947_v13, %v508_v15  ;;  %v884_v18 = vpop.f32.mrb[4].mxu0 }
  0xff   :  { %v948_v19 = vpop.f32.mrb[4].mxu1  ;;  %v885_v20 = vpop.f32.mrb[5].mxu0 }
 0x100   :  { %v846_v21 = vpack.c.bf16 %v664_v16, %v664_v16  ;;  %v665_v22 = vmax.f32 %v605_v17, 0.0  ;;  %v886_v23 = vadd.f32 %v885_v20, %v884_v18  ;;  %v949_v24 = vpop.f32.mrb[5].mxu1  ;;  %v887_v25 = vpop.f32.mrb[6].mxu0 }
 0x101   :  { %v950_v26 = vadd.f32 %v949_v24, %v948_v19  ;;  %v951_v27 = vpop.f32.mrb[6].mxu1  ;;  %v888_v28 = vpop.f32.mrb[7].mxu0 }
 0x102   :  { %745 = vst.msk [vmem:[%s1370_s3] sm:$0xf] %vm744_vm0, %v846_v21  ;;  %v847_v29 = vpack.c.bf16 %v665_v22, %v665_v22  ;;  %v513_v30 = vadd.f32 %v886_v23, %v1285_v2  ;;  %v889_v31 = vadd.f32 %v888_v28, %v887_v25  ;;  %v952_v32 = vpop.f32.mrb[7].mxu1 }
 0x103   :  { %v953_v33 = vadd.f32 %v952_v32, %v951_v27 }
 0x104   :  { %746 = vst.msk [vmem:[%s1370_s3 + $0x4] sm:$0xf] %vm744_vm0, %v847_v29  ;;  %v610_v34 = vadd.f32 %v950_v26, %v513_v30  ;;  %v516_v35 = vadd.f32 %v889_v31, %v1285_v2 }
 0x106   :  { %v666_v36 = vmax.f32 %v610_v34, 0.0  ;;  %v613_v37 = vadd.f32 %v953_v33, %v516_v35  ;;  %v890_v38 = vpop.f32.mrb[8].mxu0 }
 0x107   :  { %v954_v39 = vpop.f32.mrb[8].mxu1  ;;  %v891_v40 = vpop.f32.mrb[9].mxu0 }
 0x108   :  { %v848_v41 = vpack.c.bf16 %v666_v36, %v666_v36  ;;  %v667_v42 = vmax.f32 %v613_v37, 0.0  ;;  %v892_v43 = vadd.f32 %v891_v40, %v890_v38  ;;  %v955_v44 = vpop.f32.mrb[9].mxu1  ;;  %v893_v45 = vpop.f32.mrb[10].mxu0 }
 0x109   :  { %v956_v46 = vadd.f32 %v955_v44, %v954_v39  ;;  %v957_v47 = vpop.f32.mrb[10].mxu1  ;;  %v894_v48 = vpop.f32.mrb[11].mxu0 }
 0x10a   :  { %747 = vst.msk [vmem:[%s1370_s3 + $0x8] sm:$0xf] %vm744_vm0, %v848_v41  ;;  %v849_v49 = vpack.c.bf16 %v667_v42, %v667_v42  ;;  %v521_v50 = vadd.f32 %v892_v43, %v1285_v2  ;;  %v895_v51 = vadd.f32 %v894_v48, %v893_v45  ;;  %v958_v52 = vpop.f32.mrb[11].mxu1 }
 0x10b   :  { %v959_v53 = vadd.f32 %v958_v52, %v957_v47 }
 0x10c   :  { %748 = vst.msk [vmem:[%s1370_s3 + $0xc] sm:$0xf] %vm744_vm0, %v849_v49  ;;  %v618_v54 = vadd.f32 %v956_v46, %v521_v50  ;;  %v524_v55 = vadd.f32 %v895_v51, %v1285_v2 }
 0x10e   :  { %v668_v56 = vmax.f32 %v618_v54, 0.0  ;;  %v621_v57 = vadd.f32 %v959_v53, %v524_v55  ;;  %v896_v58 = vpop.f32.mrb[12].mxu0 }
 0x10f   :  { %v960_v59 = vpop.f32.mrb[12].mxu1  ;;  %v897_v60 = vpop.f32.mrb[13].mxu0 }
 0x110   :  { %v850_v61 = vpack.c.bf16 %v668_v56, %v668_v56  ;;  %v669_v62 = vmax.f32 %v621_v57, 0.0  ;;  %v898_v63 = vadd.f32 %v897_v60, %v896_v58  ;;  %v961_v0 = vpop.f32.mrb[13].mxu1  ;;  %v899_v1 = vpop.f32.mrb[14].mxu0 }
 0x111   :  { %v962_v3 = vadd.f32 %v961_v0, %v960_v59  ;;  %v963_v4 = vpop.f32.mrb[14].mxu1  ;;  %v900_v5 = vpop.f32.mrb[15].mxu0 }
 0x112   :  { %749 = vst.msk [vmem:[%s1370_s3 + $0x10] sm:$0xf] %vm744_vm0, %v850_v61  ;;  %v851_v6 = vpack.c.bf16 %v669_v62, %v669_v62  ;;  %v529_v7 = vadd.f32 %v898_v63, %v1285_v2  ;;  %v901_v8 = vadd.f32 %v900_v5, %v899_v1  ;;  %v964_v9 = vpop.f32.mrb[15].mxu1 }
 0x113   :  { %v965_v10 = vadd.f32 %v964_v9, %v963_v4 }
 0x114   :  { %750 = vst.msk [vmem:[%s1370_s3 + $0x14] sm:$0xf] %vm744_vm0, %v851_v6  ;;  %v626_v11 = vadd.f32 %v962_v3, %v529_v7  ;;  %v532_v12 = vadd.f32 %v901_v8, %v1285_v2 }
 0x116   :  { %v670_v13 = vmax.f32 %v626_v11, 0.0  ;;  %v629_v14 = vadd.f32 %v965_v10, %v532_v12  ;;  %v902_v15 = vpop.f32.mrb[16].mxu0 }
 0x117   :  { %v966_v16 = vpop.f32.mrb[16].mxu1  ;;  %v903_v17 = vpop.f32.mrb[17].mxu0 }
 0x118   :  { %v852_v18 = vpack.c.bf16 %v670_v13, %v670_v13  ;;  %v671_v19 = vmax.f32 %v629_v14, 0.0  ;;  %v904_v20 = vadd.f32 %v903_v17, %v902_v15  ;;  %v967_v21 = vpop.f32.mrb[17].mxu1  ;;  %v905_v22 = vpop.f32.mrb[18].mxu0 }
 0x119   :  { %v968_v23 = vadd.f32 %v967_v21, %v966_v16  ;;  %v969_v24 = vpop.f32.mrb[18].mxu1  ;;  %v906_v25 = vpop.f32.mrb[19].mxu0 }
 0x11a   :  { %751 = vst.msk [vmem:[%s1370_s3 + $0x18] sm:$0xf] %vm744_vm0, %v852_v18  ;;  %v853_v26 = vpack.c.bf16 %v671_v19, %v671_v19  ;;  %v537_v27 = vadd.f32 %v904_v20, %v1285_v2  ;;  %v907_v28 = vadd.f32 %v906_v25, %v905_v22  ;;  %v970_v29 = vpop.f32.mrb[19].mxu1 }
 0x11b   :  { %v971_v30 = vadd.f32 %v970_v29, %v969_v24 }
 0x11c   :  { %752 = vst.msk [vmem:[%s1370_s3 + $0x1c] sm:$0xf] %vm744_vm0, %v853_v26  ;;  %v634_v31 = vadd.f32 %v968_v23, %v537_v27  ;;  %v540_v32 = vadd.f32 %v907_v28, %v1285_v2 }
 0x11e   :  { %v672_v33 = vmax.f32 %v634_v31, 0.0  ;;  %v637_v34 = vadd.f32 %v971_v30, %v540_v32  ;;  %v908_v35 = vpop.f32.mrb[20].mxu0 }
 0x11f   :  { %v972_v36 = vpop.f32.mrb[20].mxu1  ;;  %v909_v37 = vpop.f32.mrb[21].mxu0 }
 0x120   :  { %v854_v38 = vpack.c.bf16 %v672_v33, %v672_v33  ;;  %v673_v39 = vmax.f32 %v637_v34, 0.0  ;;  %v910_v40 = vadd.f32 %v909_v37, %v908_v35  ;;  %v973_v41 = vpop.f32.mrb[21].mxu1  ;;  %v911_v42 = vpop.f32.mrb[22].mxu0 }
 0x121   :  { %v974_v43 = vadd.f32 %v973_v41, %v972_v36  ;;  %v975_v44 = vpop.f32.mrb[22].mxu1  ;;  %v912_v45 = vpop.f32.mrb[23].mxu0 }
 0x122   :  { %753 = vst.msk [vmem:[%s1370_s3 + $0x20] sm:$0xf] %vm744_vm0, %v854_v38  ;;  %v855_v46 = vpack.c.bf16 %v673_v39, %v673_v39  ;;  %v545_v47 = vadd.f32 %v910_v40, %v1285_v2  ;;  %v913_v48 = vadd.f32 %v912_v45, %v911_v42  ;;  %v976_v49 = vpop.f32.mrb[23].mxu1 }
 0x123   :  { %v977_v50 = vadd.f32 %v976_v49, %v975_v44 }
 0x124   :  { %754 = vst.msk [vmem:[%s1370_s3 + $0x24] sm:$0xf] %vm744_vm0, %v855_v46  ;;  %v642_v51 = vadd.f32 %v974_v43, %v545_v47  ;;  %v548_v52 = vadd.f32 %v913_v48, %v1285_v2 }
 0x126   :  { %v674_v53 = vmax.f32 %v642_v51, 0.0  ;;  %v645_v54 = vadd.f32 %v977_v50, %v548_v52  ;;  %v914_v55 = vpop.f32.mrb[24].mxu0 }
 0x127   :  { %v978_v56 = vpop.f32.mrb[24].mxu1  ;;  %v915_v57 = vpop.f32.mrb[25].mxu0 }
 0x128   :  { %v856_v58 = vpack.c.bf16 %v674_v53, %v674_v53  ;;  %v675_v59 = vmax.f32 %v645_v54, 0.0  ;;  %v916_v60 = vadd.f32 %v915_v57, %v914_v55  ;;  %v979_v61 = vpop.f32.mrb[25].mxu1  ;;  %v917_v62 = vpop.f32.mrb[26].mxu0 }
 0x129   :  { %v980_v63 = vadd.f32 %v979_v61, %v978_v56  ;;  %v981_v0 = vpop.f32.mrb[26].mxu1  ;;  %v918_v1 = vpop.f32.mrb[27].mxu0 }
 0x12a   :  { %755 = vst.msk [vmem:[%s1370_s3 + $0x28] sm:$0xf] %vm744_vm0, %v856_v58  ;;  %v857_v3 = vpack.c.bf16 %v675_v59, %v675_v59  ;;  %v553_v4 = vadd.f32 %v916_v60, %v1285_v2  ;;  %v919_v5 = vadd.f32 %v918_v1, %v917_v62  ;;  %v982_v6 = vpop.f32.mrb[27].mxu1 }
 0x12b   :  { %v983_v7 = vadd.f32 %v982_v6, %v981_v0 }
 0x12c   :  { %756 = vst.msk [vmem:[%s1370_s3 + $0x2c] sm:$0xf] %vm744_vm0, %v857_v3  ;;  %v650_v8 = vadd.f32 %v980_v63, %v553_v4  ;;  %v556_v9 = vadd.f32 %v919_v5, %v1285_v2 }
 0x12e   :  { %v676_v10 = vmax.f32 %v650_v8, 0.0  ;;  %v653_v11 = vadd.f32 %v983_v7, %v556_v9  ;;  %v920_v12 = vpop.f32.mrb[28].mxu0 }
 0x12f   :  { %v984_v13 = vpop.f32.mrb[28].mxu1  ;;  %v921_v14 = vpop.f32.mrb[29].mxu0 }
 0x130   :  { %v858_v15 = vpack.c.bf16 %v676_v10, %v676_v10  ;;  %v677_v16 = vmax.f32 %v653_v11, 0.0  ;;  %v922_v17 = vadd.f32 %v921_v14, %v920_v12  ;;  %v985_v18 = vpop.f32.mrb[29].mxu1  ;;  %v923_v19 = vpop.f32.mrb[30].mxu0 }
 0x131   :  { %v986_v20 = vadd.f32 %v985_v18, %v984_v13  ;;  %v987_v21 = vpop.f32.mrb[30].mxu1  ;;  %v924_v22 = vpop.f32.mrb[31].mxu0 }
 0x132   :  { %757 = vst.msk [vmem:[%s1370_s3 + $0x30] sm:$0xf] %vm744_vm0, %v858_v15  ;;  %v859_v23 = vpack.c.bf16 %v677_v16, %v677_v16  ;;  %v561_v24 = vadd.f32 %v922_v17, %v1285_v2  ;;  %v925_v25 = vadd.f32 %v924_v22, %v923_v19  ;;  %v988_v26 = vpop.f32.mrb[31].mxu1 }
 0x133   :  { %v989_v27 = vadd.f32 %v988_v26, %v987_v21 }
 0x134   :  { %758 = vst.msk [vmem:[%s1370_s3 + $0x34] sm:$0xf] %vm744_vm0, %v859_v23  ;;  %v658_v28 = vadd.f32 %v986_v20, %v561_v24  ;;  %v564_v29 = vadd.f32 %v925_v25, %v1285_v2 }
 0x136   :  { %v678_v30 = vmax.f32 %v658_v28, 0.0  ;;  %v661_v31 = vadd.f32 %v989_v27, %v564_v29 }
 0x138   :  { %v860_v32 = vpack.c.bf16 %v678_v30, %v678_v30  ;;  %v679_v33 = vmax.f32 %v661_v31, 0.0 }
 0x13a   :  { %759 = vst.msk [vmem:[%s1370_s3 + $0x38] sm:$0xf] %vm744_vm0, %v860_v32  ;;  %v861_v34 = vpack.c.bf16 %v679_v33, %v679_v33 }
 0x13c   :  { %760 = vst.msk [vmem:[%s1370_s3 + $0x3c] sm:$0xf] %vm744_vm0, %v861_v34 }

// kernel: enc_forward.6
= control target key start
LH: loop header
LB: loop body
LE: loop exit
PB: predicated region body
PF: predicated region fallthrough
CT: control target
= control target key end

     0   :  { %s1399_s1 = inlined_call_operand.vmem [shape: bf16[1024,128], index: 1, kind: input, shape index: {}]   ;;  %s1400_s0 = inlined_call_operand.vmem [shape: bf16[32,1024], index: 0, kind: input, shape index: {}]   ;;  %s1401_s2 = inlined_call_operand.vmem [shape: f32[1,128], index: 2, kind: input, shape index: {}]   ;;  %s1402_s3 = inlined_call_operand.vmem [shape: bf16[32,128], index: 3, kind: output, shape index: {}]  }
   0x1   :  { %v1066_v0 = vld [vmem:[%s1399_s1 + $0x40] sm:$0xff]   ;;  %v1070_v4 = vld [vmem:[%s1399_s1 + $0x48] sm:$0xff]   ;;  %v1074_v8 = vld [vmem:[%s1399_s1 + $0x50] sm:$0xff]  }
   0x2   :  { %v1067_v1 = vld [vmem:[%s1399_s1 + $0xc0] sm:$0xff]   ;;  %954 = vmatprep.subr.bf16.mxu0 %v1066_v0  ;;  %v1071_v5 = vld [vmem:[%s1399_s1 + $0xc8] sm:$0xff]   ;;  %v1075_v9 = vld [vmem:[%s1399_s1 + $0xd0] sm:$0xff]  }
   0x3   :  { %v1068_v2 = vld [vmem:[%s1399_s1] sm:$0xff]   ;;  %982 = vmatprep.subr.bf16.mxu1 %v1067_v1  ;;  %v1072_v6 = vld [vmem:[%s1399_s1 + $0x8] sm:$0xff]   ;;  %v1076_v10 = vld [vmem:[%s1399_s1 + $0x10] sm:$0xff]  }
   0x4   :  { %v1069_v3 = vld [vmem:[%s1399_s1 + $0x80] sm:$0xff]   ;;  %955 = vmatpush3.bf16.msra.mxu0 %v1068_v2  ;;  %v1073_v7 = vld [vmem:[%s1399_s1 + $0x88] sm:$0xff]   ;;  %v1077_v11 = vld [vmem:[%s1399_s1 + $0x90] sm:$0xff]  }
   0x5   :  { %983 = vmatpush3.bf16.msra.mxu1 %v1069_v3  ;;  %956 = vmatprep.subr.bf16.mxu0 %v1070_v4  ;;  %v1078_v12 = vld [vmem:[%s1399_s1 + $0x58] sm:$0xff]   ;;  %v1082_v16 = vld [vmem:[%s1399_s1 + $0x60] sm:$0xff]   ;;  %v1086_v20 = vld [vmem:[%s1399_s1 + $0x68] sm:$0xff]  }
   0x6   :  { %984 = vmatprep.subr.bf16.mxu1 %v1071_v5  ;;  %v1079_v13 = vld [vmem:[%s1399_s1 + $0xd8] sm:$0xff]   ;;  %v1083_v17 = vld [vmem:[%s1399_s1 + $0xe0] sm:$0xff]   ;;  %v1087_v21 = vld [vmem:[%s1399_s1 + $0xe8] sm:$0xff]  }
   0x7   :  { %v1080_v14 = vld [vmem:[%s1399_s1 + $0x18] sm:$0xff]   ;;  %v1084_v18 = vld [vmem:[%s1399_s1 + $0x20] sm:$0xff]   ;;  %v1088_v22 = vld [vmem:[%s1399_s1 + $0x28] sm:$0xff]  }
   0x8   :  { %957 = vmatpush3.bf16.msra.mxu0 %v1072_v6  ;;  %v1081_v15 = vld [vmem:[%s1399_s1 + $0x98] sm:$0xff]   ;;  %v1085_v19 = vld [vmem:[%s1399_s1 + $0xa0] sm:$0xff]   ;;  %v1089_v23 = vld [vmem:[%s1399_s1 + $0xa8] sm:$0xff]  }
   0x9   :  { %985 = vmatpush3.bf16.msra.mxu1 %v1073_v7  ;;  %958 = vmatprep.subr.bf16.mxu0 %v1074_v8  ;;  %v1090_v24 = vld [vmem:[%s1399_s1 + $0x70] sm:$0xff]   ;;  %v1094_v28 = vld [vmem:[%s1399_s1 + $0x78] sm:$0xff]   ;;  %v15_v32 = vld [vmem:[%s1400_s0] sm:$0xff] }
   0xa   :  { %986 = vmatprep.subr.bf16.mxu1 %v1075_v9  ;;  %v1091_v25 = vld [vmem:[%s1399_s1 + $0xf0] sm:$0xff]   ;;  %v1095_v29 = vld [vmem:[%s1399_s1 + $0xf8] sm:$0xff]   ;;  %v19_v33 = vld [vmem:[%s1400_s0 + $0x20] sm:$0xff] }
   0xb   :  { %v1092_v26 = vld [vmem:[%s1399_s1 + $0x30] sm:$0xff]   ;;  %v1096_v30 = vld [vmem:[%s1399_s1 + $0x38] sm:$0xff]   ;;  %v16_v34 = vld [vmem:[%s1400_s0 + $0x8] sm:$0xff]  ;;  %v855_v35 = vcombine.low %v15_v32, %v19_v33  ;;  %v856_v36 = vcombine.high %v15_v32, %v19_v33 }
   0xc   :  { %959 = vmatpush3.bf16.msra.mxu0 %v1076_v10  ;;  %v1093_v27 = vld [vmem:[%s1399_s1 + $0xb0] sm:$0xff]   ;;  %v1097_v31 = vld [vmem:[%s1399_s1 + $0xb8] sm:$0xff]   ;;  %v20_v37 = vld [vmem:[%s1400_s0 + $0x28] sm:$0xff] }
   0xd   :  { %987 = vmatpush3.bf16.msra.mxu1 %v1077_v11  ;;  %960 = vmatprep.subr.bf16.mxu0 %v1078_v12  ;;  %v857_v38 = vcombine.low %v16_v34, %v20_v37  ;;  %v858_v39 = vcombine.high %v16_v34, %v20_v37  ;;  %v1098_v40 = vld [vmem:[%s1399_s1 + $0x140] sm:$0xff]   ;;  %v1102_v44 = vld [vmem:[%s1399_s1 + $0x148] sm:$0xff]   ;;  %v1106_v48 = vld [vmem:[%s1399_s1 + $0x150] sm:$0xff]  }
   0xe   :  { %988 = vmatprep.subr.bf16.mxu1 %v1079_v13  ;;  %662 = vmatprep.mubr.bf16.mxu0 %v856_v36  ;;  %v1099_v41 = vld [vmem:[%s1399_s1 + $0x1c0] sm:$0xff]   ;;  %v1103_v45 = vld [vmem:[%s1399_s1 + $0x1c8] sm:$0xff]   ;;  %v1107_v49 = vld [vmem:[%s1399_s1 + $0x1d0] sm:$0xff]  }
   0xf   :  { %711 = vmatprep.mubr.bf16.mxu1 %v858_v39  ;;  %v1100_v42 = vld [vmem:[%s1399_s1 + $0x100] sm:$0xff]   ;;  %v1104_v46 = vld [vmem:[%s1399_s1 + $0x108] sm:$0xff]   ;;  %v1108_v50 = vld [vmem:[%s1399_s1 + $0x110] sm:$0xff]  }
  0x10   :  { %961 = vmatpush3.bf16.msra.mxu0 %v1080_v14  ;;  %v1101_v43 = vld [vmem:[%s1399_s1 + $0x180] sm:$0xff]   ;;  %v1105_v47 = vld [vmem:[%s1399_s1 + $0x188] sm:$0xff]   ;;  %v1109_v51 = vld [vmem:[%s1399_s1 + $0x190] sm:$0xff]  }
  0x11   :  { %989 = vmatpush3.bf16.msra.mxu1 %v1081_v15  ;;  %962 = vmatprep.subr.bf16.mxu0 %v1082_v16  ;;  %v1110_v52 = vld [vmem:[%s1399_s1 + $0x158] sm:$0xff]   ;;  %v1114_v56 = vld [vmem:[%s1399_s1 + $0x160] sm:$0xff]   ;;  %v1118_v63 = vld [vmem:[%s1399_s1 + $0x168] sm:$0xff]  }
  0x12   :  { %990 = vmatprep.subr.bf16.mxu1 %v1083_v17  ;;  %v1111_v53 = vld [vmem:[%s1399_s1 + $0x1d8] sm:$0xff]   ;;  %v1115_v57 = vld [vmem:[%s1399_s1 + $0x1e0] sm:$0xff]   ;;  %v1119_v1 = vld [vmem:[%s1399_s1 + $0x1e8] sm:$0xff]  }
  0x13   :  { %v1112_v54 = vld [vmem:[%s1399_s1 + $0x118] sm:$0xff]   ;;  %v1116_v58 = vld [vmem:[%s1399_s1 + $0x120] sm:$0xff]   ;;  %v1120_v2 = vld [vmem:[%s1399_s1 + $0x128] sm:$0xff]  }
  0x14   :  { %963 = vmatpush3.bf16.msra.mxu0 %v1084_v18  ;;  %v1113_v55 = vld [vmem:[%s1399_s1 + $0x198] sm:$0xff]   ;;  %v1117_v59 = vld [vmem:[%s1399_s1 + $0x1a0] sm:$0xff]   ;;  %v1121_v3 = vld [vmem:[%s1399_s1 + $0x1a8] sm:$0xff]  }
  0x15   :  { %991 = vmatpush3.bf16.msra.mxu1 %v1085_v19  ;;  %964 = vmatprep.subr.bf16.mxu0 %v1086_v20  ;;  %v23_v60 = vld [vmem:[%s1400_s0 + $0x40] sm:$0xff]  ;;  %v24_v4 = vld [vmem:[%s1400_s0 + $0x48] sm:$0xff]  ;;  %v1122_v8 = vld [vmem:[%s1399_s1 + $0x170] sm:$0xff]  }
  0x16   :  { %992 = vmatprep.subr.bf16.mxu1 %v1087_v21  ;;  %v27_v61 = vld [vmem:[%s1400_s0 + $0x60] sm:$0xff]  ;;  %v28_v5 = vld [vmem:[%s1400_s0 + $0x68] sm:$0xff]  ;;  %v1123_v9 = vld [vmem:[%s1399_s1 + $0x1f0] sm:$0xff]  }
  0x17   :  { %v864_v62 = vcombine.high %v23_v60, %v27_v61  ;;  %v863_v0 = vcombine.low %v23_v60, %v27_v61  ;;  %v866_v6 = vcombine.high %v24_v4, %v28_v5  ;;  %v865_v7 = vcombine.low %v24_v4, %v28_v5  ;;  %v1124_v10 = vld [vmem:[%s1399_s1 + $0x130] sm:$0xff]   ;;  %v1126_v12 = vld [vmem:[%s1399_s1 + $0x178] sm:$0xff]   ;;  %v854_v34 = vld [vmem:[%s1401_s2] ss:$0 sm:$0xff] }
  0x18   :  { %965 = vmatpush3.bf16.msra.mxu0 %v1088_v22  ;;  %v1125_v11 = vld [vmem:[%s1399_s1 + $0x1b0] sm:$0xff]   ;;  %v1127_v13 = vld [vmem:[%s1399_s1 + $0x1f8] sm:$0xff]  }
  0x19   :  { %993 = vmatpush3.bf16.msra.mxu1 %v1089_v23  ;;  %966 = vmatprep.subr.bf16.mxu0 %v1090_v24  ;;  %v1128_v14 = vld [vmem:[%s1399_s1 + $0x138] sm:$0xff]   ;;  %v17_v16 = vld [vmem:[%s1400_s0 + $0x10] sm:$0xff] }
  0x1a   :  { %994 = vmatprep.subr.bf16.mxu1 %v1091_v25  ;;  %v1129_v15 = vld [vmem:[%s1399_s1 + $0x1b8] sm:$0xff]   ;;  %v21_v17 = vld [vmem:[%s1400_s0 + $0x30] sm:$0xff] }
  0x1b   :  { %v18_v18 = vld [vmem:[%s1400_s0 + $0x18] sm:$0xff]  ;;  %v859_v20 = vcombine.low %v17_v16, %v21_v17  ;;  %v860_v21 = vcombine.high %v17_v16, %v21_v17  ;;  %v25_v24 = vld [vmem:[%s1400_s0 + $0x50] sm:$0xff] }
  0x1c   :  { %967 = vmatpush3.bf16.msra.mxu0 %v1092_v26  ;;  %v22_v19 = vld [vmem:[%s1400_s0 + $0x38] sm:$0xff]  ;;  %v29_v25 = vld [vmem:[%s1400_s0 + $0x70] sm:$0xff] }
  0x1d   :  { %995 = vmatpush3.bf16.msra.mxu1 %v1093_v27  ;;  %968 = vmatprep.subr.bf16.mxu0 %v1094_v28  ;;  %v861_v22 = vcombine.low %v18_v18, %v22_v19  ;;  %v862_v23 = vcombine.high %v18_v18, %v22_v19  ;;  %v26_v26 = vld [vmem:[%s1400_s0 + $0x58] sm:$0xff]  ;;  %v868_v27 = vcombine.high %v25_v24, %v29_v25 }
  0x1e   :  { %996 = vmatprep.subr.bf16.mxu1 %v1095_v29  ;;  %v30_v28 = vld [vmem:[%s1400_s0 + $0x78] sm:$0xff] }
  0x1f   :  { %v870_v29 = vcombine.high %v26_v26, %v30_v28 }
  0x20   :  { %969 = vmatpush3.bf16.msra.mxu0 %v1096_v30  ;;  %v867_v30 = vcombine.low %v25_v24, %v29_v25 }
  0x21   :  { %997 = vmatpush3.bf16.msra.mxu1 %v1097_v31  ;;  %1010 = vmatprep.subr.bf16.mxu0 %v1098_v40  ;;  %v869_v31 = vcombine.low %v26_v26, %v30_v28 }
  0x22   :  { %1038 = vmatprep.subr.bf16.mxu1 %v1099_v41 }
  0x23   :  { %663 = vmatmul.mubr.bf16.vlgmr.msra.gmra.mrb[0].mxu0 %v855_v35 }
  0x24   :  { %712 = vmatmul.mubr.bf16.vlgmr.msra.gmra.mrb[0].mxu1 %v857_v38  ;;  %1011 = vmatpush3.bf16.msra.mxu0 %v1100_v42 }
  0x25   :  { %1039 = vmatpush3.bf16.msra.mxu1 %v1101_v43  ;;  %1012 = vmatprep.subr.bf16.mxu0 %v1102_v44 }
  0x26   :  { %1040 = vmatprep.subr.bf16.mxu1 %v1103_v45  ;;  %670 = vmatprep.mubr.bf16.mxu0 %v864_v62 }
  0x27   :  { %719 = vmatprep.mubr.bf16.mxu1 %v866_v6 }
  0x28   :  { %1013 = vmatpush3.bf16.msra.mxu0 %v1104_v46 }
  0x29   :  { %1041 = vmatpush3.bf16.msra.mxu1 %v1105_v47  ;;  %1014 = vmatprep.subr.bf16.mxu0 %v1106_v48 }
  0x2a   :  { %1042 = vmatprep.subr.bf16.mxu1 %v1107_v49 }
  0x2b   :  { %671 = vmatmul.mubr.bf16.gmra.mrb[4].mxu0 %v863_v0 }
  0x2c   :  { %1015 = vmatpush3.bf16.msra.mxu0 %v1108_v50  ;;  %720 = vmatmul.mubr.bf16.gmra.mrb[4].mxu1 %v865_v7 }
  0x2d   :  { %1043 = vmatpush3.bf16.msra.mxu1 %v1109_v51  ;;  %1016 = vmatprep.subr.bf16.mxu0 %v1110_v52 }
  0x2e   :  { %1044 = vmatprep.subr.bf16.mxu1 %v1111_v53  ;;  %760 = vmatprep.mubr.bf16.mxu0 %v860_v21 }
  0x2f   :  { %809 = vmatprep.mubr.bf16.mxu1 %v862_v23 }
  0x30   :  { %1017 = vmatpush3.bf16.msra.mxu0 %v1112_v54 }
  0x31   :  { %1045 = vmatpush3.bf16.msra.mxu1 %v1113_v55  ;;  %1018 = vmatprep.subr.bf16.mxu0 %v1114_v56 }
  0x32   :  { %1046 = vmatprep.subr.bf16.mxu1 %v1115_v57 }
  0x34   :  { %1019 = vmatpush3.bf16.msra.mxu0 %v1116_v58 }
  0x35   :  { %1047 = vmatpush3.bf16.msra.mxu1 %v1117_v59  ;;  %1020 = vmatprep.subr.bf16.mxu0 %v1118_v63 }
  0x36   :  { %1048 = vmatprep.subr.bf16.mxu1 %v1119_v1 }
  0x38   :  { %1021 = vmatpush3.bf16.msra.mxu0 %v1120_v2 }
  0x39   :  { %1049 = vmatpush3.bf16.msra.mxu1 %v1121_v3  ;;  %1022 = vmatprep.subr.bf16.mxu0 %v1122_v8 }
  0x3a   :  { %1050 = vmatprep.subr.bf16.mxu1 %v1123_v9 }
  0x3c   :  { %1023 = vmatpush3.bf16.msra.mxu0 %v1124_v10 }
  0x3d   :  { %1051 = vmatpush3.bf16.msra.mxu1 %v1125_v11  ;;  %1024 = vmatprep.subr.bf16.mxu0 %v1126_v12 }
  0x3e   :  { %1052 = vmatprep.subr.bf16.mxu1 %v1127_v13 }
  0x40   :  { %1025 = vmatpush3.bf16.msra.mxu0 %v1128_v14 }
  0x41   :  { %1053 = vmatpush3.bf16.msra.mxu1 %v1129_v15 }
  0x43   :  { %761 = vmatmul.mubr.bf16.vlgmr.msra.gmra.mrb[8].mxu0 %v859_v20 }
  0x44   :  { %810 = vmatmul.mubr.bf16.vlgmr.msra.gmra.mrb[8].mxu1 %v861_v22  ;;  %768 = vmatprep.mubr.bf16.mxu0 %v868_v27 }
  0x45   :  { %817 = vmatprep.mubr.bf16.mxu1 %v870_v29 }
  0x4b   :  { %769 = vmatmul.mubr.bf16.gmra.mrb[12].mxu0 %v867_v30 }
  0x4c   :  { %818 = vmatmul.mubr.bf16.gmra.mrb[12].mxu1 %v869_v31 }
  0xf6   :  { %v970_v32 = vpop.f32.mrb[0].mxu0 }
  0xf7   :  { %v998_v33 = vpop.f32.mrb[0].mxu1  ;;  %v971_v35 = vpop.f32.mrb[1].mxu0 }
  0xf8   :  { %v972_v36 = vadd.f32 %v971_v35, %v970_v32  ;;  %v999_v37 = vpop.f32.mrb[1].mxu1  ;;  %v973_v38 = vpop.f32.mrb[2].mxu0 }
  0xf9   :  { %v1000_v39 = vadd.f32 %v999_v37, %v998_v33  ;;  %v1001_v40 = vpop.f32.mrb[2].mxu1  ;;  %v974_v41 = vpop.f32.mrb[3].mxu0 }
  0xfa   :  { %v665_v42 = vadd.f32 %v972_v36, %v854_v34  ;;  %v975_v43 = vadd.f32 %v974_v41, %v973_v38  ;;  %v1002_v44 = vpop.f32.mrb[3].mxu1 }
  0xfb   :  { %v1003_v45 = vadd.f32 %v1002_v44, %v1001_v40 }
  0xfc   :  { %v714_v46 = vadd.f32 %v1000_v39, %v665_v42  ;;  %v668_v47 = vadd.f32 %v975_v43, %v854_v34 }
  0xfe   :  { %v717_v48 = vadd.f32 %v1003_v45, %v668_v47  ;;  %v976_v49 = vpop.f32.mrb[4].mxu0 }
  0xff   :  { %v977_v50 = vpop.f32.mrb[5].mxu0  ;;  %v1004_v56 = vpop.f32.mrb[4].mxu1 }
 0x100   :  { %v978_v51 = vadd.f32 %v977_v50, %v976_v49  ;;  %v979_v52 = vpop.f32.mrb[6].mxu0  ;;  %v1005_v57 = vpop.f32.mrb[5].mxu1 }
 0x101   :  { %v980_v53 = vpop.f32.mrb[7].mxu0  ;;  %v1006_v59 = vadd.f32 %v1005_v57, %v1004_v56  ;;  %v1007_v60 = vpop.f32.mrb[6].mxu1 }
 0x102   :  { %v981_v54 = vadd.f32 %v980_v53, %v979_v52  ;;  %v673_v55 = vadd.f32 %v978_v51, %v854_v34  ;;  %v1008_v61 = vpop.f32.mrb[7].mxu1 }
 0x103   :  { %v1009_v63 = vadd.f32 %v1008_v61, %v1007_v60 }
 0x104   :  { %v676_v58 = vadd.f32 %v981_v54, %v854_v34  ;;  %v722_v62 = vadd.f32 %v1006_v59, %v673_v55 }
 0x106   :  { %v725_v0 = vadd.f32 %v1009_v63, %v676_v58 }
 0x116   :  { %v1026_v1 = vpop.f32.mrb[8].mxu0 }
 0x117   :  { %v1054_v2 = vpop.f32.mrb[8].mxu1  ;;  %v1027_v3 = vpop.f32.mrb[9].mxu0 }
 0x118   :  { %v1055_v4 = vpop.f32.mrb[9].mxu1  ;;  %v1028_v5 = vadd.f32 %v1027_v3, %v1026_v1  ;;  %v1029_v7 = vpop.f32.mrb[10].mxu0 }
 0x119   :  { %v1056_v6 = vadd.f32 %v1055_v4, %v1054_v2  ;;  %v1057_v8 = vpop.f32.mrb[10].mxu1  ;;  %v1030_v9 = vpop.f32.mrb[11].mxu0 }
 0x11a   :  { %v1058_v10 = vpop.f32.mrb[11].mxu1  ;;  %v763_v11 = vadd.f32 %v1028_v5, %v714_v46  ;;  %v1031_v12 = vadd.f32 %v1030_v9, %v1029_v7 }
 0x11b   :  { %v1059_v13 = vadd.f32 %v1058_v10, %v1057_v8 }
 0x11c   :  { %v812_v14 = vadd.f32 %v1056_v6, %v763_v11  ;;  %v766_v15 = vadd.f32 %v1031_v12, %v717_v48 }
 0x11e   :  { %v815_v16 = vadd.f32 %v1059_v13, %v766_v15  ;;  %v1032_v17 = vpop.f32.mrb[12].mxu0  ;;  %v826_v21 = vmax.f32 %v812_v14, 0.0 }
 0x11f   :  { %v1060_v18 = vpop.f32.mrb[12].mxu1  ;;  %v1033_v19 = vpop.f32.mrb[13].mxu0 }
 0x120   :  { %v1061_v20 = vpop.f32.mrb[13].mxu1  ;;  %v827_v22 = vmax.f32 %v815_v16, 0.0  ;;  %v1034_v23 = vadd.f32 %v1033_v19, %v1032_v17  ;;  %v1035_v25 = vpop.f32.mrb[14].mxu0 }
 0x121   :  { %v1062_v24 = vadd.f32 %v1061_v20, %v1060_v18  ;;  %v1063_v26 = vpop.f32.mrb[14].mxu1  ;;  %v1036_v27 = vpop.f32.mrb[15].mxu0 }
 0x122   :  { %v1064_v28 = vpop.f32.mrb[15].mxu1  ;;  %v946_v29 = vpack.c.bf16 %v827_v22, %v826_v21  ;;  %v771_v30 = vadd.f32 %v1034_v23, %v722_v62  ;;  %v1037_v31 = vadd.f32 %v1036_v27, %v1035_v25 }
 0x123   :  { %v1065_v32 = vadd.f32 %v1064_v28, %v1063_v26 }
 0x124   :  { %947 = vst [vmem:[%s1402_s3] sm:$0xff] %v946_v29   ;;  %v820_v33 = vadd.f32 %v1062_v24, %v771_v30  ;;  %v774_v34 = vadd.f32 %v1037_v31, %v725_v0 }
 0x126   :  { %v823_v35 = vadd.f32 %v1065_v32, %v774_v34  ;;  %v828_v36 = vmax.f32 %v820_v33, 0.0 }
 0x128   :  { %v829_v37 = vmax.f32 %v823_v35, 0.0 }
 0x12a   :  { %v951_v38 = vpack.c.bf16 %v829_v37, %v828_v36 }
 0x12c   :  { %953 = vst [vmem:[%s1402_s3 + $0x8] sm:$0xff] %v951_v38  }

// kernel: enc_forward.7
= control target key start
LH: loop header
LB: loop body
LE: loop exit
PB: predicated region body
PF: predicated region fallthrough
CT: control target
= control target key end

     0   :  { %vm1475_vm1 = vcmask 326656   ;;  %s2438_s1 = inlined_call_operand.vmem [shape: bf16[2048,40], index: 1, kind: input, shape index: {}]   ;;  %s2439_s0 = inlined_call_operand.vmem [shape: bf16[16,2048], index: 0, kind: input, shape index: {}]   ;;  %s2440_s2 = inlined_call_operand.vmem [shape: f32[1,40], index: 2, kind: input, shape index: {}]   ;;  %s2441_s3 = inlined_call_operand.vmem [shape: f32[16,40], index: 3, kind: output, shape index: {}]  }
   0x1   :  { %v1831_v0 = vld [vmem:[%s2438_s1 + $0x40] sm:$0xff]   ;;  %v1835_v4 = vld [vmem:[%s2438_s1 + $0x48] sm:$0xff]   ;;  %v1839_v8 = vld [vmem:[%s2438_s1 + $0x50] sm:$0xff]  }
   0x2   :  { %v1832_v1 = vld [vmem:[%s2438_s1 + $0xc0] sm:$0xff]   ;;  %1655 = vmatprep.subr.bf16.mxu0 %v1831_v0  ;;  %v1836_v5 = vld [vmem:[%s2438_s1 + $0xc8] sm:$0xff]   ;;  %v1840_v9 = vld [vmem:[%s2438_s1 + $0xd0] sm:$0xff]  }
   0x3   :  { %v1833_v2 = vld [vmem:[%s2438_s1] sm:$0xff]   ;;  %1677 = vmatprep.subr.bf16.mxu1 %v1832_v1  ;;  %v1837_v6 = vld [vmem:[%s2438_s1 + $0x8] sm:$0xff]   ;;  %v1841_v10 = vld [vmem:[%s2438_s1 + $0x10] sm:$0xff]  }
   0x4   :  { %v1834_v3 = vld [vmem:[%s2438_s1 + $0x80] sm:$0xff]   ;;  %1656 = vmatpush3.bf16.msra.mxu0 %v1833_v2  ;;  %v1838_v7 = vld [vmem:[%s2438_s1 + $0x88] sm:$0xff]   ;;  %v1842_v11 = vld [vmem:[%s2438_s1 + $0x90] sm:$0xff]  }
   0x5   :  { %1678 = vmatpush3.bf16.msra.mxu1 %v1834_v3  ;;  %1657 = vmatprep.subr.bf16.mxu0 %v1835_v4  ;;  %v1843_v12 = vld [vmem:[%s2438_s1 + $0x58] sm:$0xff]   ;;  %v1847_v16 = vld [vmem:[%s2438_s1 + $0x60] sm:$0xff]   ;;  %v1851_v20 = vld [vmem:[%s2438_s1 + $0x68] sm:$0xff]  }
   0x6   :  { %1679 = vmatprep.subr.bf16.mxu1 %v1836_v5  ;;  %v1844_v13 = vld [vmem:[%s2438_s1 + $0xd8] sm:$0xff]   ;;  %v1848_v17 = vld [vmem:[%s2438_s1 + $0xe0] sm:$0xff]   ;;  %v1852_v21 = vld [vmem:[%s2438_s1 + $0xe8] sm:$0xff]  }
   0x7   :  { %v1845_v14 = vld [vmem:[%s2438_s1 + $0x18] sm:$0xff]   ;;  %v1849_v18 = vld [vmem:[%s2438_s1 + $0x20] sm:$0xff]   ;;  %v1853_v22 = vld [vmem:[%s2438_s1 + $0x28] sm:$0xff]  }
   0x8   :  { %1658 = vmatpush3.bf16.msra.mxu0 %v1837_v6  ;;  %v1846_v15 = vld [vmem:[%s2438_s1 + $0x98] sm:$0xff]   ;;  %v1850_v19 = vld [vmem:[%s2438_s1 + $0xa0] sm:$0xff]   ;;  %v1854_v23 = vld [vmem:[%s2438_s1 + $0xa8] sm:$0xff]  }
   0x9   :  { %1680 = vmatpush3.bf16.msra.mxu1 %v1838_v7  ;;  %1659 = vmatprep.subr.bf16.mxu0 %v1839_v8  ;;  %v1855_v24 = vld [vmem:[%s2438_s1 + $0x70] sm:$0xff]   ;;  %v1859_v28 = vld [vmem:[%s2438_s1 + $0x78] sm:$0xff]   ;;  %v15_v32 = vld [vmem:[%s2439_s0] sm:$0xff] }
   0xa   :  { %1681 = vmatprep.subr.bf16.mxu1 %v1840_v9  ;;  %v1856_v25 = vld [vmem:[%s2438_s1 + $0xf0] sm:$0xff]   ;;  %v1860_v29 = vld [vmem:[%s2438_s1 + $0xf8] sm:$0xff]   ;;  %v23_v33 = vld [vmem:[%s2439_s0 + $0x40] sm:$0xff] }
   0xb   :  { %v1857_v26 = vld [vmem:[%s2438_s1 + $0x30] sm:$0xff]   ;;  %v1861_v30 = vld [vmem:[%s2438_s1 + $0x38] sm:$0xff]   ;;  %v16_v34 = vld [vmem:[%s2439_s0 + $0x8] sm:$0xff]  ;;  %v1511_v35 = vcombine.low %v15_v32, %v23_v33  ;;  %v1512_v36 = vcombine.high %v15_v32, %v23_v33 }
   0xc   :  { %1660 = vmatpush3.bf16.msra.mxu0 %v1841_v10  ;;  %v1858_v27 = vld [vmem:[%s2438_s1 + $0xb0] sm:$0xff]   ;;  %v1862_v31 = vld [vmem:[%s2438_s1 + $0xb8] sm:$0xff]   ;;  %v24_v37 = vld [vmem:[%s2439_s0 + $0x48] sm:$0xff] }
   0xd   :  { %1682 = vmatpush3.bf16.msra.mxu1 %v1842_v11  ;;  %1661 = vmatprep.subr.bf16.mxu0 %v1843_v12  ;;  %v1513_v38 = vcombine.low %v16_v34, %v24_v37  ;;  %v1514_v39 = vcombine.high %v16_v34, %v24_v37  ;;  %v1863_v40 = vld [vmem:[%s2438_s1 + $0x140] sm:$0xff]   ;;  %v1867_v44 = vld [vmem:[%s2438_s1 + $0x148] sm:$0xff]   ;;  %v1871_v48 = vld [vmem:[%s2438_s1 + $0x150] sm:$0xff]  }
   0xe   :  { %1683 = vmatprep.subr.bf16.mxu1 %v1844_v13  ;;  %1174 = vmatprep.mubr.bf16.mxu0 %v1512_v36  ;;  %v1864_v41 = vld [vmem:[%s2438_s1 + $0x1c0] sm:$0xff]   ;;  %v1868_v45 = vld [vmem:[%s2438_s1 + $0x1c8] sm:$0xff]   ;;  %v1872_v49 = vld [vmem:[%s2438_s1 + $0x1d0] sm:$0xff]  }
   0xf   :  { %1215 = vmatprep.mubr.bf16.mxu1 %v1514_v39  ;;  %v1865_v42 = vld [vmem:[%s2438_s1 + $0x100] sm:$0xff]   ;;  %v1869_v46 = vld [vmem:[%s2438_s1 + $0x108] sm:$0xff]   ;;  %v1873_v50 = vld [vmem:[%s2438_s1 + $0x110] sm:$0xff]  }
  0x10   :  { %1662 = vmatpush3.bf16.msra.mxu0 %v1845_v14  ;;  %v1866_v43 = vld [vmem:[%s2438_s1 + $0x180] sm:$0xff]   ;;  %v1870_v47 = vld [vmem:[%s2438_s1 + $0x188] sm:$0xff]   ;;  %v1874_v51 = vld [vmem:[%s2438_s1 + $0x190] sm:$0xff]  }
  0x11   :  { %1684 = vmatpush3.bf16.msra.mxu1 %v1846_v15  ;;  %1663 = vmatprep.subr.bf16.mxu0 %v1847_v16  ;;  %v1875_v52 = vld [vmem:[%s2438_s1 + $0x158] sm:$0xff]   ;;  %v1879_v56 = vld [vmem:[%s2438_s1 + $0x160] sm:$0xff]   ;;  %v1883_v60 = vld [vmem:[%s2438_s1 + $0x168] sm:$0xff]  }
  0x12   :  { %1685 = vmatprep.subr.bf16.mxu1 %v1848_v17  ;;  %v1876_v53 = vld [vmem:[%s2438_s1 + $0x1d8] sm:$0xff]   ;;  %v1880_v57 = vld [vmem:[%s2438_s1 + $0x1e0] sm:$0xff]   ;;  %v1884_v61 = vld [vmem:[%s2438_s1 + $0x1e8] sm:$0xff]  }
  0x13   :  { %v1877_v54 = vld [vmem:[%s2438_s1 + $0x118] sm:$0xff]   ;;  %v1881_v58 = vld [vmem:[%s2438_s1 + $0x120] sm:$0xff]   ;;  %v1885_v62 = vld [vmem:[%s2438_s1 + $0x128] sm:$0xff]  }
  0x14   :  { %1664 = vmatpush3.bf16.msra.mxu0 %v1849_v18  ;;  %v1878_v55 = vld [vmem:[%s2438_s1 + $0x198] sm:$0xff]   ;;  %v1882_v59 = vld [vmem:[%s2438_s1 + $0x1a0] sm:$0xff]   ;;  %v1886_v63 = vld [vmem:[%s2438_s1 + $0x1a8] sm:$0xff]  }
  0x15   :  { %1686 = vmatpush3.bf16.msra.mxu1 %v1850_v19  ;;  %1665 = vmatprep.subr.bf16.mxu0 %v1851_v20  ;;  %v1887_v0 = vld [vmem:[%s2438_s1 + $0x170] sm:$0xff]   ;;  %v1891_v4 = vld [vmem:[%s2438_s1 + $0x178] sm:$0xff]   ;;  %v1895_v16 = vld [vmem:[%s2438_s1 + $0x240] sm:$0xff]  }
  0x16   :  { %1687 = vmatprep.subr.bf16.mxu1 %v1852_v21  ;;  %v1888_v1 = vld [vmem:[%s2438_s1 + $0x1f0] sm:$0xff]   ;;  %v1892_v5 = vld [vmem:[%s2438_s1 + $0x1f8] sm:$0xff]   ;;  %v1896_v17 = vld [vmem:[%s2438_s1 + $0x2c0] sm:$0xff]  }
  0x17   :  { %v1889_v2 = vld [vmem:[%s2438_s1 + $0x130] sm:$0xff]   ;;  %v1893_v6 = vld [vmem:[%s2438_s1 + $0x138] sm:$0xff]   ;;  %v1897_v18 = vld [vmem:[%s2438_s1 + $0x200] sm:$0xff]  }
  0x18   :  { %1666 = vmatpush3.bf16.msra.mxu0 %v1853_v22  ;;  %v1890_v3 = vld [vmem:[%s2438_s1 + $0x1b0] sm:$0xff]   ;;  %v1894_v7 = vld [vmem:[%s2438_s1 + $0x1b8] sm:$0xff]   ;;  %v1898_v19 = vld [vmem:[%s2438_s1 + $0x280] sm:$0xff]  }
  0x19   :  { %1688 = vmatpush3.bf16.msra.mxu1 %v1854_v23  ;;  %1667 = vmatprep.subr.bf16.mxu0 %v1855_v24  ;;  %v17_v8 = vld [vmem:[%s2439_s0 + $0x10] sm:$0xff]  ;;  %v18_v12 = vld [vmem:[%s2439_s0 + $0x18] sm:$0xff]  ;;  %v1899_v20 = vld [vmem:[%s2438_s1 + $0x248] sm:$0xff]  }
  0x1a   :  { %1689 = vmatprep.subr.bf16.mxu1 %v1856_v25  ;;  %v25_v9 = vld [vmem:[%s2439_s0 + $0x50] sm:$0xff]  ;;  %v26_v13 = vld [vmem:[%s2439_s0 + $0x58] sm:$0xff]  ;;  %v1900_v21 = vld [vmem:[%s2438_s1 + $0x2c8] sm:$0xff]  }
  0x1b   :  { %v1515_v10 = vcombine.low %v17_v8, %v25_v9  ;;  %v1516_v11 = vcombine.high %v17_v8, %v25_v9  ;;  %v1517_v14 = vcombine.low %v18_v12, %v26_v13  ;;  %v1518_v15 = vcombine.high %v18_v12, %v26_v13  ;;  %v1901_v22 = vld [vmem:[%s2438_s1 + $0x208] sm:$0xff]   ;;  %v1903_v24 = vld [vmem:[%s2438_s1 + $0x250] sm:$0xff]   ;;  %v1911_v32 = vld [vmem:[%s2438_s1 + $0x260] sm:$0xff]  }
  0x1c   :  { %1668 = vmatpush3.bf16.msra.mxu0 %v1857_v26  ;;  %v1902_v23 = vld [vmem:[%s2438_s1 + $0x288] sm:$0xff]   ;;  %v1904_v25 = vld [vmem:[%s2438_s1 + $0x2d0] sm:$0xff]   ;;  %v1912_v33 = vld [vmem:[%s2438_s1 + $0x2e0] sm:$0xff]  }
  0x1d   :  { %1690 = vmatpush3.bf16.msra.mxu1 %v1858_v27  ;;  %1669 = vmatprep.subr.bf16.mxu0 %v1859_v28  ;;  %v1905_v26 = vld [vmem:[%s2438_s1 + $0x210] sm:$0xff]   ;;  %v1907_v28 = vld [vmem:[%s2438_s1 + $0x258] sm:$0xff]   ;;  %v1913_v34 = vld [vmem:[%s2438_s1 + $0x220] sm:$0xff]  }
  0x1e   :  { %1691 = vmatprep.subr.bf16.mxu1 %v1860_v29  ;;  %v1906_v27 = vld [vmem:[%s2438_s1 + $0x290] sm:$0xff]   ;;  %v1908_v29 = vld [vmem:[%s2438_s1 + $0x2d8] sm:$0xff]   ;;  %v1915_v36 = vld [vmem:[%s2438_s1 + $0x268] sm:$0xff]  }
  0x1f   :  { %v1916_v37 = vld [vmem:[%s2438_s1 + $0x2e8] sm:$0xff]   ;;  %v1943_v8 = vld [vmem:[%s2438_s1 + $0x360] sm:$0xff]  }
  0x20   :  { %1670 = vmatpush3.bf16.msra.mxu0 %v1861_v30  ;;  %v1909_v30 = vld [vmem:[%s2438_s1 + $0x218] sm:$0xff]   ;;  %v1918_v39 = vld [vmem:[%s2438_s1 + $0x2a8] sm:$0xff]   ;;  %v1944_v9 = vld [vmem:[%s2438_s1 + $0x3e0] sm:$0xff]  }
  0x21   :  { %1692 = vmatpush3.bf16.msra.mxu1 %v1862_v31  ;;  %1699 = vmatprep.subr.bf16.mxu0 %v1863_v40  ;;  %v1910_v31 = vld [vmem:[%s2438_s1 + $0x298] sm:$0xff]   ;;  %v1919_v40 = vld [vmem:[%s2438_s1 + $0x270] sm:$0xff]   ;;  %v1947_v12 = vld [vmem:[%s2438_s1 + $0x368] sm:$0xff]  }
  0x22   :  { %1721 = vmatprep.subr.bf16.mxu1 %v1864_v41  ;;  %v1920_v41 = vld [vmem:[%s2438_s1 + $0x2f0] sm:$0xff]   ;;  %v1948_v13 = vld [vmem:[%s2438_s1 + $0x3e8] sm:$0xff]  }
  0x23   :  { %1175 = vmatmul.mubr.bf16.vlgmr.msra.gmra.mrb[0].mxu0 %v1511_v35  ;;  %v1914_v35 = vld [vmem:[%s2438_s1 + $0x2a0] sm:$0xff]  }
  0x24   :  { %1216 = vmatmul.mubr.bf16.vlgmr.msra.gmra.mrb[0].mxu1 %v1513_v38  ;;  %1700 = vmatpush3.bf16.msra.mxu0 %v1865_v42  ;;  %v1917_v38 = vld [vmem:[%s2438_s1 + $0x228] sm:$0xff]   ;;  %v1921_v42 = vld [vmem:[%s2438_s1 + $0x230] sm:$0xff]  }
  0x25   :  { %1722 = vmatpush3.bf16.msra.mxu1 %v1866_v43  ;;  %1701 = vmatprep.subr.bf16.mxu0 %v1867_v44  ;;  %v1922_v43 = vld [vmem:[%s2438_s1 + $0x2b0] sm:$0xff]   ;;  %v1923_v44 = vld [vmem:[%s2438_s1 + $0x278] sm:$0xff]  }
  0x26   :  { %1723 = vmatprep.subr.bf16.mxu1 %v1868_v45  ;;  %1256 = vmatprep.mubr.bf16.mxu0 %v1516_v11  ;;  %v1924_v45 = vld [vmem:[%s2438_s1 + $0x2f8] sm:$0xff]   ;;  %v1946_v11 = vld [vmem:[%s2438_s1 + $0x3a0] sm:$0xff]  }
  0x27   :  { %1297 = vmatprep.mubr.bf16.mxu1 %v1518_v15  ;;  %v1950_v15 = vld [vmem:[%s2438_s1 + $0x3a8] sm:$0xff]  }
  0x28   :  { %1702 = vmatpush3.bf16.msra.mxu0 %v1869_v46  ;;  %v1925_v46 = vld [vmem:[%s2438_s1 + $0x238] sm:$0xff]  }
  0x29   :  { %1724 = vmatpush3.bf16.msra.mxu1 %v1870_v47  ;;  %1703 = vmatprep.subr.bf16.mxu0 %v1871_v48  ;;  %v1926_v47 = vld [vmem:[%s2438_s1 + $0x2b8] sm:$0xff]   ;;  %v19_v48 = vld [vmem:[%s2439_s0 + $0x20] sm:$0xff] }
  0x2a   :  { %1725 = vmatprep.subr.bf16.mxu1 %v1872_v49  ;;  %v27_v49 = vld [vmem:[%s2439_s0 + $0x60] sm:$0xff] }
  0x2c   :  { %1704 = vmatpush3.bf16.msra.mxu0 %v1873_v50  ;;  %v20_v50 = vld [vmem:[%s2439_s0 + $0x28] sm:$0xff] }
  0x2d   :  { %1726 = vmatpush3.bf16.msra.mxu1 %v1874_v51  ;;  %1705 = vmatprep.subr.bf16.mxu0 %v1875_v52  ;;  %v28_v51 = vld [vmem:[%s2439_s0 + $0x68] sm:$0xff]  ;;  %v1519_v52 = vcombine.low %v19_v48, %v27_v49 }
  0x2e   :  { %1727 = vmatprep.subr.bf16.mxu1 %v1876_v53  ;;  %v1520_v53 = vcombine.high %v19_v48, %v27_v49 }
  0x30   :  { %1706 = vmatpush3.bf16.msra.mxu0 %v1877_v54  ;;  %v1521_v54 = vcombine.low %v20_v50, %v28_v51 }
  0x31   :  { %1728 = vmatpush3.bf16.msra.mxu1 %v1878_v55  ;;  %1707 = vmatprep.subr.bf16.mxu0 %v1879_v56  ;;  %v1522_v55 = vcombine.high %v20_v50, %v28_v51  ;;  %v1927_v56 = vld [vmem:[%s2438_s1 + $0x340] sm:$0xff]  }
  0x32   :  { %1729 = vmatprep.subr.bf16.mxu1 %v1880_v57  ;;  %v1928_v57 = vld [vmem:[%s2438_s1 + $0x3c0] sm:$0xff]  }
  0x34   :  { %1708 = vmatpush3.bf16.msra.mxu0 %v1881_v58  ;;  %v1929_v58 = vld [vmem:[%s2438_s1 + $0x300] sm:$0xff]  }
  0x35   :  { %1730 = vmatpush3.bf16.msra.mxu1 %v1882_v59  ;;  %1709 = vmatprep.subr.bf16.mxu0 %v1883_v60  ;;  %v1930_v59 = vld [vmem:[%s2438_s1 + $0x380] sm:$0xff]   ;;  %v1931_v60 = vld [vmem:[%s2438_s1 + $0x348] sm:$0xff]  }
  0x36   :  { %1731 = vmatprep.subr.bf16.mxu1 %v1884_v61  ;;  %v1932_v61 = vld [vmem:[%s2438_s1 + $0x3c8] sm:$0xff]  }
  0x38   :  { %1710 = vmatpush3.bf16.msra.mxu0 %v1885_v62  ;;  %v1933_v62 = vld [vmem:[%s2438_s1 + $0x308] sm:$0xff]  }
  0x39   :  { %1732 = vmatpush3.bf16.msra.mxu1 %v1886_v63  ;;  %1711 = vmatprep.subr.bf16.mxu0 %v1887_v0  ;;  %v1934_v63 = vld [vmem:[%s2438_s1 + $0x388] sm:$0xff]   ;;  %v1935_v0 = vld [vmem:[%s2438_s1 + $0x350] sm:$0xff]  }
  0x3a   :  { %1733 = vmatprep.subr.bf16.mxu1 %v1888_v1  ;;  %v1936_v1 = vld [vmem:[%s2438_s1 + $0x3d0] sm:$0xff]  }
  0x3c   :  { %1712 = vmatpush3.bf16.msra.mxu0 %v1889_v2  ;;  %v1937_v2 = vld [vmem:[%s2438_s1 + $0x310] sm:$0xff]  }
  0x3d   :  { %1734 = vmatpush3.bf16.msra.mxu1 %v1890_v3  ;;  %1713 = vmatprep.subr.bf16.mxu0 %v1891_v4  ;;  %v1938_v3 = vld [vmem:[%s2438_s1 + $0x390] sm:$0xff]   ;;  %v1939_v4 = vld [vmem:[%s2438_s1 + $0x358] sm:$0xff]  }
  0x3e   :  { %1735 = vmatprep.subr.bf16.mxu1 %v1892_v5  ;;  %v1940_v5 = vld [vmem:[%s2438_s1 + $0x3d8] sm:$0xff]  }
  0x40   :  { %1714 = vmatpush3.bf16.msra.mxu0 %v1893_v6  ;;  %v1941_v6 = vld [vmem:[%s2438_s1 + $0x318] sm:$0xff]  }
  0x41   :  { %1736 = vmatpush3.bf16.msra.mxu1 %v1894_v7  ;;  %1743 = vmatprep.subr.bf16.mxu0 %v1895_v16  ;;  %v1942_v7 = vld [vmem:[%s2438_s1 + $0x398] sm:$0xff]   ;;  %v1951_v16 = vld [vmem:[%s2438_s1 + $0x370] sm:$0xff]  }
  0x42   :  { %1765 = vmatprep.subr.bf16.mxu1 %v1896_v17  ;;  %v1952_v17 = vld [vmem:[%s2438_s1 + $0x3f0] sm:$0xff]  }
  0x43   :  { %1257 = vmatmul.mubr.bf16.vlgmr.msra.gmra.mrb[4].mxu0 %v1515_v10  ;;  %v1945_v10 = vld [vmem:[%s2438_s1 + $0x320] sm:$0xff]  }
  0x44   :  { %1298 = vmatmul.mubr.bf16.vlgmr.msra.gmra.mrb[4].mxu1 %v1517_v14  ;;  %1744 = vmatpush3.bf16.msra.mxu0 %v1897_v18  ;;  %v1949_v14 = vld [vmem:[%s2438_s1 + $0x328] sm:$0xff]   ;;  %v1953_v18 = vld [vmem:[%s2438_s1 + $0x330] sm:$0xff]  }
  0x45   :  { %1766 = vmatpush3.bf16.msra.mxu1 %v1898_v19  ;;  %1745 = vmatprep.subr.bf16.mxu0 %v1899_v20  ;;  %v1954_v19 = vld [vmem:[%s2438_s1 + $0x3b0] sm:$0xff]   ;;  %v1955_v20 = vld [vmem:[%s2438_s1 + $0x378] sm:$0xff]  }
  0x46   :  { %1767 = vmatprep.subr.bf16.mxu1 %v1900_v21  ;;  %1338 = vmatprep.mubr.bf16.mxu0 %v1520_v53  ;;  %v1956_v21 = vld [vmem:[%s2438_s1 + $0x3f8] sm:$0xff]  }
  0x47   :  { %1379 = vmatprep.mubr.bf16.mxu1 %v1522_v55 }
  0x48   :  { %1746 = vmatpush3.bf16.msra.mxu0 %v1901_v22  ;;  %v1957_v22 = vld [vmem:[%s2438_s1 + $0x338] sm:$0xff]  }
  0x49   :  { %1768 = vmatpush3.bf16.msra.mxu1 %v1902_v23  ;;  %1747 = vmatprep.subr.bf16.mxu0 %v1903_v24  ;;  %v1958_v23 = vld [vmem:[%s2438_s1 + $0x3b8] sm:$0xff]   ;;  %v21_v24 = vld [vmem:[%s2439_s0 + $0x30] sm:$0xff] }
  0x4a   :  { %1769 = vmatprep.subr.bf16.mxu1 %v1904_v25  ;;  %v29_v25 = vld [vmem:[%s2439_s0 + $0x70] sm:$0xff] }
  0x4c   :  { %1748 = vmatpush3.bf16.msra.mxu0 %v1905_v26  ;;  %v22_v26 = vld [vmem:[%s2439_s0 + $0x38] sm:$0xff] }
  0x4d   :  { %1770 = vmatpush3.bf16.msra.mxu1 %v1906_v27  ;;  %1749 = vmatprep.subr.bf16.mxu0 %v1907_v28  ;;  %v1523_v27 = vcombine.low %v21_v24, %v29_v25  ;;  %v1524_v28 = vcombine.high %v21_v24, %v29_v25 }
  0x4e   :  { %1771 = vmatprep.subr.bf16.mxu1 %v1908_v29  ;;  %v30_v29 = vld [vmem:[%s2439_s0 + $0x78] sm:$0xff] }
  0x50   :  { %1750 = vmatpush3.bf16.msra.mxu0 %v1909_v30  ;;  %v1525_v30 = vcombine.low %v22_v26, %v30_v29 }
  0x51   :  { %1772 = vmatpush3.bf16.msra.mxu1 %v1910_v31  ;;  %1751 = vmatprep.subr.bf16.mxu0 %v1911_v32  ;;  %v1526_v31 = vcombine.high %v22_v26, %v30_v29 }
  0x52   :  { %1773 = vmatprep.subr.bf16.mxu1 %v1912_v33 }
  0x54   :  { %1752 = vmatpush3.bf16.msra.mxu0 %v1913_v34  ;;  %v1510_v34 = vld [vmem:[%s2440_s2] ss:$0 sm:$0xff] }
  0x55   :  { %1774 = vmatpush3.bf16.msra.mxu1 %v1914_v35  ;;  %1753 = vmatprep.subr.bf16.mxu0 %v1915_v36 }
  0x56   :  { %1775 = vmatprep.subr.bf16.mxu1 %v1916_v37 }
  0x58   :  { %1754 = vmatpush3.bf16.msra.mxu0 %v1917_v38 }
  0x59   :  { %1776 = vmatpush3.bf16.msra.mxu1 %v1918_v39  ;;  %1755 = vmatprep.subr.bf16.mxu0 %v1919_v40 }
  0x5a   :  { %1777 = vmatprep.subr.bf16.mxu1 %v1920_v41 }
  0x5c   :  { %1756 = vmatpush3.bf16.msra.mxu0 %v1921_v42 }
  0x5d   :  { %1778 = vmatpush3.bf16.msra.mxu1 %v1922_v43  ;;  %1757 = vmatprep.subr.bf16.mxu0 %v1923_v44 }
  0x5e   :  { %1779 = vmatprep.subr.bf16.mxu1 %v1924_v45 }
  0x60   :  { %1758 = vmatpush3.bf16.msra.mxu0 %v1925_v46 }
  0x61   :  { %1780 = vmatpush3.bf16.msra.mxu1 %v1926_v47  ;;  %1787 = vmatprep.subr.bf16.mxu0 %v1927_v56 }
  0x62   :  { %1809 = vmatprep.subr.bf16.mxu1 %v1928_v57 }
  0x63   :  { %1339 = vmatmul.mubr.bf16.vlgmr.msra.gmra.mrb[8].mxu0 %v1519_v52 }
  0x64   :  { %1380 = vmatmul.mubr.bf16.vlgmr.msra.gmra.mrb[8].mxu1 %v1521_v54  ;;  %1788 = vmatpush3.bf16.msra.mxu0 %v1929_v58 }
  0x65   :  { %1810 = vmatpush3.bf16.msra.mxu1 %v1930_v59  ;;  %1789 = vmatprep.subr.bf16.mxu0 %v1931_v60 }
  0x66   :  { %1811 = vmatprep.subr.bf16.mxu1 %v1932_v61  ;;  %1420 = vmatprep.mubr.bf16.mxu0 %v1524_v28 }
  0x67   :  { %1461 = vmatprep.mubr.bf16.mxu1 %v1526_v31 }
  0x68   :  { %1790 = vmatpush3.bf16.msra.mxu0 %v1933_v62 }
  0x69   :  { %1812 = vmatpush3.bf16.msra.mxu1 %v1934_v63  ;;  %1791 = vmatprep.subr.bf16.mxu0 %v1935_v0 }
  0x6a   :  { %1813 = vmatprep.subr.bf16.mxu1 %v1936_v1 }
  0x6c   :  { %1792 = vmatpush3.bf16.msra.mxu0 %v1937_v2 }
  0x6d   :  { %1814 = vmatpush3.bf16.msra.mxu1 %v1938_v3  ;;  %1793 = vmatprep.subr.bf16.mxu0 %v1939_v4 }
  0x6e   :  { %1815 = vmatprep.subr.bf16.mxu1 %v1940_v5 }
  0x70   :  { %1794 = vmatpush3.bf16.msra.mxu0 %v1941_v6 }
  0x71   :  { %1816 = vmatpush3.bf16.msra.mxu1 %v1942_v7  ;;  %1795 = vmatprep.subr.bf16.mxu0 %v1943_v8 }
  0x72   :  { %1817 = vmatprep.subr.bf16.mxu1 %v1944_v9 }
  0x74   :  { %1796 = vmatpush3.bf16.msra.mxu0 %v1945_v10 }
  0x75   :  { %1818 = vmatpush3.bf16.msra.mxu1 %v1946_v11  ;;  %1797 = vmatprep.subr.bf16.mxu0 %v1947_v12 }
  0x76   :  { %1819 = vmatprep.subr.bf16.mxu1 %v1948_v13 }
  0x78   :  { %1798 = vmatpush3.bf16.msra.mxu0 %v1949_v14 }
  0x79   :  { %1820 = vmatpush3.bf16.msra.mxu1 %v1950_v15  ;;  %1799 = vmatprep.subr.bf16.mxu0 %v1951_v16 }
  0x7a   :  { %1821 = vmatprep.subr.bf16.mxu1 %v1952_v17  ;;  %v1470_v17 = vlaneseq }
  0x7c   :  { %1800 = vmatpush3.bf16.msra.mxu0 %v1953_v18 }
  0x7d   :  { %1822 = vmatpush3.bf16.msra.mxu1 %v1954_v19  ;;  %1801 = vmatprep.subr.bf16.mxu0 %v1955_v20 }
  0x7e   :  { %1823 = vmatprep.subr.bf16.mxu1 %v1956_v21  ;;  %v1471_v21 = vand.u32 127, %v1470_v17 }
  0x80   :  { %1802 = vmatpush3.bf16.msra.mxu0 %v1957_v22  ;;  %vm1472_vm0 = vcmp.ge.s32.totalorder %v1471_v21, 20 }
  0x81   :  { %1824 = vmatpush3.bf16.msra.mxu1 %v1958_v23 }
  0x83   :  { %1421 = vmatmul.mubr.bf16.vlgmr.msra.gmra.mrb[12].mxu0 %v1523_v27 }
  0x84   :  { %1462 = vmatmul.mubr.bf16.vlgmr.msra.gmra.mrb[12].mxu1 %v1525_v30 }
  0xf6   :  { %v1671_v32 = vpop.f32.mrb[0].mxu0 }
  0xf7   :  { %v1693_v33 = vpop.f32.mrb[0].mxu1  ;;  %v1672_v35 = vpop.f32.mrb[1].mxu0 }
  0xf8   :  { %v1673_v36 = vadd.f32 %v1672_v35, %v1671_v32  ;;  %v1694_v37 = vpop.f32.mrb[1].mxu1  ;;  %v1674_v38 = vpop.f32.mrb[2].mxu0 }
  0xf9   :  { %v1695_v39 = vadd.f32 %v1694_v37, %v1693_v33  ;;  %v1696_v40 = vpop.f32.mrb[2].mxu1  ;;  %v1675_v41 = vpop.f32.mrb[3].mxu0 }
  0xfa   :  { %v1177_v42 = vadd.f32 %v1673_v36, %v1510_v34  ;;  %v1676_v43 = vadd.f32 %v1675_v41, %v1674_v38  ;;  %v1697_v44 = vpop.f32.mrb[3].mxu1 }
  0xfb   :  { %v1698_v45 = vadd.f32 %v1697_v44, %v1696_v40 }
  0xfc   :  { %v1218_v46 = vadd.f32 %v1695_v39, %v1177_v42  ;;  %v1180_v47 = vadd.f32 %v1676_v43, %v1510_v34 }
  0xfe   :  { %v1221_v48 = vadd.f32 %v1698_v45, %v1180_v47 }
 0x116   :  { %v1715_v49 = vpop.f32.mrb[4].mxu0 }
 0x117   :  { %v1737_v50 = vpop.f32.mrb[4].mxu1  ;;  %v1716_v51 = vpop.f32.mrb[5].mxu0 }
 0x118   :  { %v1717_v52 = vadd.f32 %v1716_v51, %v1715_v49  ;;  %v1738_v53 = vpop.f32.mrb[5].mxu1  ;;  %v1718_v54 = vpop.f32.mrb[6].mxu0 }
 0x119   :  { %v1739_v55 = vadd.f32 %v1738_v53, %v1737_v50  ;;  %v1740_v56 = vpop.f32.mrb[6].mxu1  ;;  %v1719_v57 = vpop.f32.mrb[7].mxu0 }
 0x11a   :  { %v1259_v58 = vadd.f32 %v1717_v52, %v1218_v46  ;;  %v1720_v59 = vadd.f32 %v1719_v57, %v1718_v54  ;;  %v1741_v60 = vpop.f32.mrb[7].mxu1 }
 0x11b   :  { %v1742_v61 = vadd.f32 %v1741_v60, %v1740_v56 }
 0x11c   :  { %v1300_v62 = vadd.f32 %v1739_v55, %v1259_v58  ;;  %v1262_v63 = vadd.f32 %v1720_v59, %v1221_v48 }
 0x11e   :  { %v1303_v0 = vadd.f32 %v1742_v61, %v1262_v63 }
 0x136   :  { %v1759_v1 = vpop.f32.mrb[8].mxu0 }
 0x137   :  { %v1781_v2 = vpop.f32.mrb[8].mxu1  ;;  %v1760_v3 = vpop.f32.mrb[9].mxu0 }
 0x138   :  { %v1782_v4 = vpop.f32.mrb[9].mxu1  ;;  %v1761_v5 = vadd.f32 %v1760_v3, %v1759_v1  ;;  %v1762_v7 = vpop.f32.mrb[10].mxu0 }
 0x139   :  { %v1783_v6 = vadd.f32 %v1782_v4, %v1781_v2  ;;  %v1784_v8 = vpop.f32.mrb[10].mxu1  ;;  %v1763_v9 = vpop.f32.mrb[11].mxu0 }
 0x13a   :  { %v1785_v10 = vpop.f32.mrb[11].mxu1  ;;  %v1341_v11 = vadd.f32 %v1761_v5, %v1300_v62  ;;  %v1764_v12 = vadd.f32 %v1763_v9, %v1762_v7 }
 0x13b   :  { %v1786_v13 = vadd.f32 %v1785_v10, %v1784_v8 }
 0x13c   :  { %v1382_v14 = vadd.f32 %v1783_v6, %v1341_v11  ;;  %v1344_v15 = vadd.f32 %v1764_v12, %v1303_v0 }
 0x13e   :  { %v1385_v16 = vadd.f32 %v1786_v13, %v1344_v15 }
 0x156   :  { %v1803_v18 = vpop.f32.mrb[12].mxu0 }
 0x157   :  { %v1825_v19 = vpop.f32.mrb[12].mxu1  ;;  %v1804_v20 = vpop.f32.mrb[13].mxu0 }
 0x158   :  { %v1805_v22 = vadd.f32 %v1804_v20, %v1803_v18  ;;  %v1826_v23 = vpop.f32.mrb[13].mxu1  ;;  %v1806_v24 = vpop.f32.mrb[14].mxu0 }
 0x159   :  { %v1827_v25 = vadd.f32 %v1826_v23, %v1825_v19  ;;  %v1828_v26 = vpop.f32.mrb[14].mxu1  ;;  %v1807_v27 = vpop.f32.mrb[15].mxu0 }
 0x15a   :  { %v1423_v28 = vadd.f32 %v1805_v22, %v1382_v14  ;;  %v1808_v29 = vadd.f32 %v1807_v27, %v1806_v24  ;;  %v1829_v30 = vpop.f32.mrb[15].mxu1 }
 0x15b   :  { %v1830_v31 = vadd.f32 %v1829_v30, %v1828_v26 }
 0x15c   :  { %v1464_v32 = vadd.f32 %v1827_v25, %v1423_v28  ;;  %v1426_v33 = vadd.f32 %v1808_v29, %v1385_v16 }
 0x15e   :  { %v1467_v34 = vadd.f32 %v1830_v31, %v1426_v33  ;;  %v1473_v35 = vsel %vm1472_vm0, %v1464_v32, -inf }
 0x15f   :  { %v1476_v36 = vsel %vm1475_vm1, %v1473_v35, -inf }
 0x160   :  { %1477 = vmax.xlane.f32.xlu0 %v1476_v36  ;;  %v1474_v37 = vsel %vm1472_vm0, %v1467_v34, -inf }
 0x161   :  { %v1479_v38 = vsel %vm1475_vm1, %v1474_v37, -inf }
 0x164   :  { %1480 = vmax.xlane.f32.xlu0 %v1479_v38 }
 0x1ed   :  { %v1478_v39 = vpop.xlane.xlu0 %1477 }
 0x1ee   :  { %v1482_v40 = vsub.f32 %v1473_v35, %v1478_v39 }
 0x1f0   :  { %v1484_v41 = vmul.f32 1.442695, %v1482_v40 }
 0x1f1   :  { %v1481_v42 = vpop.xlane.xlu0 %1480 }
 0x1f2   :  { %1959 = vpow2.f32 %v1484_v41  ;;  %v1483_v43 = vsub.f32 %v1474_v37, %v1481_v42 }
 0x1f4   :  { %v1486_v44 = vmul.f32 1.442695, %v1483_v43 }
 0x1f6   :  { %1961 = vpow2.f32 %v1486_v44 }
 0x1fc   :  { %v1960_v45 = vpop.eup %1959 }
 0x1fd   :  { %v1488_v46 = vsel %vm1475_vm1, %v1960_v45, 0.0 }
 0x1fe   :  { %1489 = vadd.xlane.f32.xlu1 %v1488_v46 }
 0x200   :  { %v1962_v47 = vpop.eup %1961 }
 0x201   :  { %v1491_v48 = vsel %vm1475_vm1, %v1962_v47, 0.0 }
 0x202   :  { %1492 = vadd.xlane.f32.xlu1 %v1491_v48 }
 0x28b   :  { %v1490_v49 = vpop.xlane.xlu1 %1489 }
 0x28c   :  { %1963 = vrcp.f32 %v1490_v49 }
 0x28f   :  { %v1493_v50 = vpop.xlane.xlu1 %1492 }
 0x290   :  { %1965 = vrcp.f32 %v1493_v50 }
 0x296   :  { %v1964_v51 = vpop.eup %1963 }
 0x297   :  { %v1496_v52 = vmul.f32 %v1964_v51, %v1960_v45 }
 0x299   :  { %v1498_v53 = vmul.f32 20.0, %v1496_v52 }
 0x29a   :  { %v1966_v54 = vpop.eup %1965 }
 0x29b   :  { %v1500_v55 = vadd.f32 1e-06, %v1498_v53  ;;  %v1497_v56 = vmul.f32 %v1966_v54, %v1962_v47 }
 0x29d   :  { %v1502_v57 = vsel %vm1472_vm0, %v1500_v55, %v1464_v32  ;;  %v1499_v58 = vmul.f32 20.0, %v1497_v56 }
 0x29e   :  { %1504 = vst.msk [vmem:[%s2441_s3] sm:$0xff] %vm1475_vm1, %v1502_v57 }
 0x29f   :  { %v1501_v59 = vadd.f32 1e-06, %v1499_v58 }
 0x2a1   :  { %v1503_v60 = vsel %vm1472_vm0, %v1501_v59, %v1467_v34 }
 0x2a2   :  { %1505 = vst.msk [vmem:[%s2441_s3 + $0x8] sm:$0xff] %vm1475_vm1, %v1503_v60 }

</bundles_post_ra>
